<compile_context>
chip_gen: v7x
topology: tpu7x:2x2x1
jax: 0.10.0
libtpu: 0.0.40
codegen_flags: <defaults>
</compile_context>

<pallas_src>
import functools

import jax
import jax.numpy as jnp
from jax import lax
from jax.experimental import pallas as pl
from jax.experimental.pallas import tpu as pltpu

EPS = 1e-5
LANE = 128


# ------------------------------ small helpers ------------------------------

def _round_up(x, m):
    return ((x + m - 1) // m) * m


def _pick_tile(total, cap, mult):
    """Largest tile <= cap that is a multiple of `mult` and divides `total`."""
    t = min(cap, total)
    t -= t % mult
    t = max(t, mult)
    while total % t:
        t -= mult
    return t


def _m_tiling(m):
    """(tile_m, padded_M).  Large tiles (<=512 rows) amortize per-step overhead."""
    if m >= 512:
        return 512, _round_up(m, 512)
    mp = _round_up(m, 8)
    return mp, mp


def _pad_row(v, cp):
    v = jnp.asarray(v, jnp.float32).reshape(1, -1)
    return jnp.pad(v, ((0, 0), (0, cp - v.shape[1])))


# ------------------------------ Pallas kernels ------------------------------

def _conv_stats_kernel(p_ref, w_ref, y_ref, psum_ref, psq_ref, acc_ref):
    """(tm,tk)@(tk,tn) accumulated over the K grid axis; on the last K step the
    result tile is written out together with per-tile BN partial statistics."""
    k = pl.program_id(2)

    @pl.when(k == 0)
    def _():
        acc_ref[...] = jnp.zeros_like(acc_ref)

    acc_ref[...] += jnp.dot(p_ref[...], w_ref[...],
                            preferred_element_type=jnp.float32)

    @pl.when(k == pl.num_programs(2) - 1)
    def _():
        y = acc_ref[...]
        y_ref[...] = y
        # per-(M-tile, N-tile) partial channel sums; row 0 carries the value,
        # rows 1..7 are zero so a plain sum over rows in the wrapper is exact.
        psum_ref[...] = jnp.zeros_like(psum_ref)
        psq_ref[...] = jnp.zeros_like(psq_ref)
        psum_ref[0:1, :] = jnp.sum(y, axis=0, keepdims=True)
        psq_ref[0:1, :] = jnp.sum(y * y, axis=0, keepdims=True)


def _bn_relu_kernel(y_ref, scale_ref, shift_ref, o_ref):
    # relu(scale * y + shift) -- no residual operand (no zero tensor traffic)
    o_ref[...] = jnp.maximum(y_ref[...] * scale_ref[...] + shift_ref[...], 0.0)


def _bn_add_relu_kernel(y_ref, res_ref, scale_ref, shift_ref, o_ref):
    # identity-shortcut path: relu(scale * y + shift + residual)
    o_ref[...] = jnp.maximum(
        y_ref[...] * scale_ref[...] + shift_ref[...] + res_ref[...], 0.0)


def _bn_shortcut_relu_kernel(y_ref, xs_ref, w3_ref, b3_ref,
                             scale_ref, shift_ref, o_ref):
    # 1x1-shortcut path fused: relu(scale * y + shift + (xs @ w3 + b3))
    res = jnp.dot(xs_ref[...], w3_ref[...],
                  preferred_element_type=jnp.float32) + b3_ref[...]
    o_ref[...] = jnp.maximum(
        y_ref[...] * scale_ref[...] + shift_ref[...] + res, 0.0)


# --------------------------- pallas_call wrappers ---------------------------

def _conv_matmul_stats(patches, w, tm):
    mp, kp = patches.shape
    _, cp = w.shape
    tk = _pick_tile(kp, 512, LANE)
    tn = _pick_tile(cp, 256, LANE)
    mt, nt, kt = mp // tm, cp // tn, kp // tk
    return pl.pallas_call(
        _conv_stats_kernel,
        out_shape=(
            jax.ShapeDtypeStruct((mp, cp), jnp.float32),
            jax.ShapeDtypeStruct((mt * 8, cp), jnp.float32),
            jax.ShapeDtypeStruct((mt * 8, cp), jnp.float32),
        ),
        grid=(mt, nt, kt),
        in_specs=[
            pl.BlockSpec((tm, tk), lambda m, n, k: (m, k)),
            pl.BlockSpec((tk, tn), lambda m, n, k: (k, n)),
        ],
        out_specs=(
            pl.BlockSpec((tm, tn), lambda m, n, k: (m, n)),
            pl.BlockSpec((8, tn), lambda m, n, k: (m, n)),
            pl.BlockSpec((8, tn), lambda m, n, k: (m, n)),
        ),
        scratch_shapes=[pltpu.VMEM((tm, tn), jnp.float32)],
        compiler_params=pltpu.CompilerParams(
            dimension_semantics=("parallel", "parallel", "arbitrary")),
    )(patches, w)


def _bn_relu(y, scale, shift, tm):
    mp, cp = y.shape
    return pl.pallas_call(
        _bn_relu_kernel,
        out_shape=jax.ShapeDtypeStruct((mp, cp), jnp.float32),
        grid=(mp // tm,),
        in_specs=[
            pl.BlockSpec((tm, cp), lambda i: (i, 0)),
            pl.BlockSpec((1, cp), lambda i: (0, 0)),
            pl.BlockSpec((1, cp), lambda i: (0, 0)),
        ],
        out_specs=pl.BlockSpec((tm, cp), lambda i: (i, 0)),
        compiler_params=pltpu.CompilerParams(dimension_semantics=("parallel",)),
    )(y, scale, shift)


def _bn_add_relu(y, res, scale, shift, tm):
    mp, cp = y.shape
    return pl.pallas_call(
        _bn_add_relu_kernel,
        out_shape=jax.ShapeDtypeStruct((mp, cp), jnp.float32),
        grid=(mp // tm,),
        in_specs=[
            pl.BlockSpec((tm, cp), lambda i: (i, 0)),
            pl.BlockSpec((tm, cp), lambda i: (i, 0)),
            pl.BlockSpec((1, cp), lambda i: (0, 0)),
            pl.BlockSpec((1, cp), lambda i: (0, 0)),
        ],
        out_specs=pl.BlockSpec((tm, cp), lambda i: (i, 0)),
        compiler_params=pltpu.CompilerParams(dimension_semantics=("parallel",)),
    )(y, res, scale, shift)


def _bn_shortcut_conv_add_relu(y, xs, w3, b3, scale, shift, tm):
    mp, cp = y.shape
    _, cin_p = xs.shape
    return pl.pallas_call(
        _bn_shortcut_relu_kernel,
        out_shape=jax.ShapeDtypeStruct((mp, cp), jnp.float32),
        grid=(mp // tm,),
        in_specs=[
            pl.BlockSpec((tm, cp), lambda i: (i, 0)),
            pl.BlockSpec((tm, cin_p), lambda i: (i, 0)),
            pl.BlockSpec((cin_p, cp), lambda i: (0, 0)),
            pl.BlockSpec((1, cp), lambda i: (0, 0)),
            pl.BlockSpec((1, cp), lambda i: (0, 0)),
            pl.BlockSpec((1, cp), lambda i: (0, 0)),
        ],
        out_specs=pl.BlockSpec((tm, cp), lambda i: (i, 0)),
        compiler_params=pltpu.CompilerParams(dimension_semantics=("parallel",)),
    )(y, xs, w3, b3, scale, shift)


# ------------------------------- conv plumbing ------------------------------

def _im2col(x_nhwc, kh, kw, stride, pad):
    n, h, w, c = x_nhwc.shape
    xp = jnp.pad(x_nhwc, ((0, 0), (pad, pad), (pad, pad), (0, 0)))
    ho = (h + 2 * pad - kh) // stride + 1
    wo = (w + 2 * pad - kw) // stride + 1
    cols = []
    for i in range(kh):
        for j in range(kw):
            cols.append(xp[:, i:i + (ho - 1) * stride + 1:stride,
                           j:j + (wo - 1) * stride + 1:stride, :])
    patches = jnp.concatenate(cols, axis=-1)          # feature order (kh, kw, C)
    return patches.reshape(n * ho * wo, kh * kw * c), (n, ho, wo)


def _conv_bn_stats(x_nhwc, w_oihw, stride, pad, cp):
    """3x3 conv (bias-free: cancelled by BN) + fused batch-stat partials."""
    _, _, _, cx = x_nhwc.shape
    cout, cin, kh, kw = w_oihw.shape
    if cx > cin:   # activation channels were lane-padded upstream
        w_oihw = jnp.pad(w_oihw, ((0, 0), (0, cx - cin), (0, 0), (0, 0)))
        cin = cx

    patches, (n, ho, wo) = _im2col(x_nhwc, kh, kw, stride, pad)
    m, k = patches.shape
    kp = _round_up(k, LANE)
    tm, mp = _m_tiling(m)
    patches = jnp.pad(patches, ((0, mp - m), (0, kp - k)))

    w_mat = jnp.transpose(w_oihw, (2, 3, 1, 0)).reshape(k, cout)
    w_mat = jnp.pad(w_mat, ((0, kp - k), (0, cp - cout)))

    y, psum, psq = _conv_matmul_stats(patches, w_mat, tm)

    # Finalize BN batch stats from per-tile partials (padded rows are zeros and
    # contribute nothing; divide by the true element count).
    mean = jnp.sum(psum, axis=0, keepdims=True) / m
    var = jnp.maximum(jnp.sum(psq, axis=0, keepdims=True) / m - mean * mean, 0.0)
    return y, mean, var, (n, ho, wo), m, tm


# ----------------------------- Residual forward -----------------------------

@functools.partial(jax.jit, static_argnums=(2, 3))
def residual_forward(x_nchw, params, strides, use_1x1conv):
    x = jnp.transpose(x_nchw, (0, 2, 3, 1)).astype(jnp.float32)   # NCHW -> NHWC
    n, h, w, cin = x.shape
    cout = params["w1"].shape[0]
    cp = _round_up(cout, LANE)                                    # lane-dense C

    # ---- conv1 (+fused BN1 stats) -> bn1 -> relu ----
    y1, mean1, var1, (n1, ho, wo), m1, tm1 = _conv_bn_stats(
        x, params["w1"], strides, 1, cp)
    scale1 = _pad_row(params["gamma1"], cp) * lax.rsqrt(var1 + EPS)
    shift1 = _pad_row(params["beta1"], cp) - mean1 * scale1
    a1 = _bn_relu(y1, scale1, shift1, tm1)
    a1_nhwc = a1[:m1].reshape(n1, ho, wo, cp)

    # ---- conv2 (+fused BN2 stats) ----
    y2, mean2, var2, (n2, ho2, wo2), m2, tm2 = _conv_bn_stats(
        a1_nhwc, params["w2"], 1, 1, cp)
    scale2 = _pad_row(params["gamma2"], cp) * lax.rsqrt(var2 + EPS)
    shift2 = _pad_row(params["beta2"], cp) - mean2 * scale2
    mp2 = y2.shape[0]

    # ---- shortcut + bn2 + add + relu (single fused kernel) ----
    if use_1x1conv:
        cin_p = _round_up(cin, LANE)
        xs = x[:, ::strides, ::strides, :].reshape(n * ho2 * wo2, cin)
        xs = jnp.pad(xs, ((0, mp2 - m2), (0, cin_p - cin)))
        w3 = jnp.pad(params["w3"].reshape(cout, cin).T,
                     ((0, cin_p - cin), (0, cp - cout)))
        b3 = _pad_row(params["b3"], cp)
        out = _bn_shortcut_conv_add_relu(y2, xs, w3, b3, scale2, shift2, tm2)
    else:
        # identity shortcut (requires strides == 1 and cin == cout, as in PyTorch)
        res = jnp.pad(x.reshape(n * h * w, cin), ((0, mp2 - m2), (0, cp - cin)))
        out = _bn_add_relu(y2, res, scale2, shift2, tm2)

    out = out[:m2].reshape(n2, ho2, wo2, cp)[:, :, :, :cout]
    return jnp.transpose(out, (0, 3, 1, 2))                       # NHWC -> NCHW


# -------------------------------- reference ---------------------------------

def residual_reference(x_nchw, params, strides, use_1x1conv):
    def conv(x, w, b, stride, pad):
        y = lax.conv_general_dilated(
            x, w, (stride, stride), [(pad, pad), (pad, pad)],
            dimension_numbers=("NCHW", "OIHW", "NCHW"))
        return y + b.reshape(1, -1, 1, 1)

    def bn(y, gamma, beta):
        mean = jnp.mean(y, axis=(0, 2, 3), keepdims=True)
        var = jnp.mean((y - mean) ** 2, axis=(0, 2, 3), keepdims=True)
        return (gamma.reshape(1, -1, 1, 1) * (y - mean) / jnp.sqrt(var + EPS)
                + beta.reshape(1, -1, 1, 1))

    y = jax.nn.relu(bn(conv(x_nchw, params["w1"], params["b1"], strides, 1),
                       params["gamma1"], params["beta1"]))
    y = bn(conv(y, params["w2"], params["b2"], 1, 1),
           params["gamma2"], params["beta2"])
    if use_1x1conv:
        x_nchw = conv(x_nchw, params["w3"], params["b3"], strides, 0)
    return jax.nn.relu(y + x_nchw)


# ---------------------------------- main -------------------------------------

def make_params(key, cin, cout):
    ks = jax.random.split(key, 6)

    def conv_init(kw_, kb_, co, ci, kh, kwid):
        fan_in = ci * kh * kwid
        bound = 1.0 / jnp.sqrt(fan_in)
        w = jax.random.uniform(kw_, (co, ci, kh, kwid), jnp.float32, -bound, bound)
        b = jax.random.uniform(kb_, (co,), jnp.float32, -bound, bound)
        return w, b

    w1, b1 = conv_init(ks[0], ks[1], cout, cin, 3, 3)
    w2, b2 = conv_init(ks[2], ks[3], cout, cout, 3, 3)
    w3, b3 = conv_init(ks[4], ks[5], cout, cin, 1, 1)
    return {
        "w1": w1, "b1": b1, "w2": w2, "b2": b2, "w3": w3, "b3": b3,
        "gamma1": jnp.ones((cout,), jnp.float32),
        "beta1": jnp.zeros((cout,), jnp.float32),
        "gamma2": jnp.ones((cout,), jnp.float32),
        "beta2": jnp.zeros((cout,), jnp.float32),
    }


if __name__ == "__main__":
    key = jax.random.PRNGKey(0)
    kx, kp = jax.random.split(key)

    N, CIN, H, W = 2, 4, 16, 16
    COUT, STRIDES, USE_1X1 = 8, 2, True

    x = jax.random.uniform(kx, (N, CIN, H, W), jnp.float32)
    params = make_params(kp, CIN, COUT)

    out = jax.block_until_ready(residual_forward(x, params, STRIDES, USE_1X1))
    ref = jax.block_until_ready(residual_reference(x, params, STRIDES, USE_1X1))

    assert out.shape == (N, COUT, H // STRIDES, W // STRIDES), out.shape
    err = float(jnp.max(jnp.abs(out - ref)))
    assert jnp.allclose(out, ref, atol=1e-4, rtol=1e-4), err

    print("KERNEL_OK")
</pallas_src>

<mosaic_0001>
module attributes {stable_mosaic.version = 11 : i64} {
  func.func @_conv_stats_kernel(%arg0: i32, %arg1: i32, %arg2: i32, %arg3: memref<128x128xf32, #tpu.memory_space<vmem>>, %arg4: memref<128x128xf32, #tpu.memory_space<vmem>>, %arg5: memref<128x128xf32, #tpu.memory_space<vmem>>, %arg6: memref<8x128xf32, #tpu.memory_space<vmem>>, %arg7: memref<8x128xf32, #tpu.memory_space<vmem>>, %arg8: memref<128x128xf32, #tpu.memory_space<vmem>>) attributes {dimension_semantics = [#tpu.dimension_semantics<parallel>, #tpu.dimension_semantics<parallel>, #tpu.dimension_semantics<arbitrary>], iteration_bounds = array<i64: 1, 1, 1>, scalar_prefetch = 0 : i64, scratch_operands = 1 : i64, tpu.core_type = #tpu.core_type<tc>, window_params = [{transform_indices = @transform_0, window_bounds = array<i64: 128, 128>}, {transform_indices = @transform_1, window_bounds = array<i64: 128, 128>}, {transform_indices = @transform_2, window_bounds = array<i64: 128, 128>}, {transform_indices = @transform_3, window_bounds = array<i64: 8, 128>}, {transform_indices = @transform_4, window_bounds = array<i64: 8, 128>}]} {
    %c0_i32 = arith.constant 0 : i32
    %0 = arith.cmpi eq, %arg2, %c0_i32 : i32
    %1 = arith.extui %0 : i1 to i32
    %c0_i32_0 = arith.constant 0 : i32
    %2 = arith.cmpi ne, %1, %c0_i32_0 : i32
    scf.if %2 {
      %cst_10 = arith.constant 0.000000e+00 : f32
      %12 = vector.broadcast %cst_10 : f32 to vector<128x128xf32>
      %c0_11 = arith.constant 0 : index
      %c0_12 = arith.constant 0 : index
      %13 = vector.load %arg8[%c0_11, %c0_12] : memref<128x128xf32, #tpu.memory_space<vmem>>, vector<128x128xf32>
      tpu.vector_store %arg8[%c0_11, %c0_12], %12 {strides = array<i32>} : memref<128x128xf32, #tpu.memory_space<vmem>>, vector<128x128xf32>,
    } else {
    }
    %c0 = arith.constant 0 : index
    %c0_1 = arith.constant 0 : index
    %3 = vector.load %arg8[%c0, %c0_1] : memref<128x128xf32, #tpu.memory_space<vmem>>, vector<128x128xf32>
    %c0_2 = arith.constant 0 : index
    %c0_3 = arith.constant 0 : index
    %4 = vector.load %arg3[%c0_2, %c0_3] : memref<128x128xf32, #tpu.memory_space<vmem>>, vector<128x128xf32>
    %c0_4 = arith.constant 0 : index
    %c0_5 = arith.constant 0 : index
    %5 = vector.load %arg4[%c0_4, %c0_5] : memref<128x128xf32, #tpu.memory_space<vmem>>, vector<128x128xf32>
    %cst = arith.constant dense<0.000000e+00> : vector<128x128xf32>
    %6 = tpu.matmul %4, %5, %cst {dimension_numbers = #tpu.dot_dimension_numbers<[1], [0], [0], [1], [0, 0, 1, 1], [], []>} : vector<128x128xf32>, vector<128x128xf32>, vector<128x128xf32> -> vector<128x128xf32>
    %7 = arith.addf %3, %6 : vector<128x128xf32>
    %c0_6 = arith.constant 0 : index
    %c0_7 = arith.constant 0 : index
    %8 = vector.load %arg8[%c0_6, %c0_7] : memref<128x128xf32, #tpu.memory_space<vmem>>, vector<128x128xf32>
    tpu.vector_store %arg8[%c0_6, %c0_7], %7 {strides = array<i32>} : memref<128x128xf32, #tpu.memory_space<vmem>>, vector<128x128xf32>,
    %c0_i32_8 = arith.constant 0 : i32
    %9 = arith.cmpi eq, %arg2, %c0_i32_8 : i32
    %10 = arith.extui %9 : i1 to i32
    %c0_i32_9 = arith.constant 0 : i32
    %11 = arith.cmpi ne, %10, %c0_i32_9 : i32
    scf.if %11 {
      %c0_10 = arith.constant 0 : index
      %c0_11 = arith.constant 0 : index
      %12 = vector.load %arg8[%c0_10, %c0_11] : memref<128x128xf32, #tpu.memory_space<vmem>>, vector<128x128xf32>
      %c0_12 = arith.constant 0 : index
      %c0_13 = arith.constant 0 : index
      %13 = vector.load %arg5[%c0_12, %c0_13] : memref<128x128xf32, #tpu.memory_space<vmem>>, vector<128x128xf32>
      tpu.vector_store %arg5[%c0_12, %c0_13], %12 {strides = array<i32>} : memref<128x128xf32, #tpu.memory_space<vmem>>, vector<128x128xf32>,
      %cst_14 = arith.constant 0.000000e+00 : f32
      %14 = vector.broadcast %cst_14 : f32 to vector<8x128xf32>
      %c0_15 = arith.constant 0 : index
      %c0_16 = arith.constant 0 : index
      %15 = vector.load %arg6[%c0_15, %c0_16] : memref<8x128xf32, #tpu.memory_space<vmem>>, vector<8x128xf32>
      tpu.vector_store %arg6[%c0_15, %c0_16], %14 {strides = array<i32>} : memref<8x128xf32, #tpu.memory_space<vmem>>, vector<8x128xf32>,
      %cst_17 = arith.constant 0.000000e+00 : f32
      %16 = vector.broadcast %cst_17 : f32 to vector<8x128xf32>
      %c0_18 = arith.constant 0 : index
      %c0_19 = arith.constant 0 : index
      %17 = vector.load %arg7[%c0_18, %c0_19] : memref<8x128xf32, #tpu.memory_space<vmem>>, vector<8x128xf32>
      tpu.vector_store %arg7[%c0_18, %c0_19], %16 {strides = array<i32>} : memref<8x128xf32, #tpu.memory_space<vmem>>, vector<8x128xf32>,
      %cst_20 = arith.constant dense<0.000000e+00> : vector<128xf32>
      %18 = vector.multi_reduction <add>, %12, %cst_20 [0] : vector<128x128xf32> to vector<128xf32>
      %19 = vector.shape_cast %18 : vector<128xf32> to vector<1x128xf32>
      %c0_21 = arith.constant 0 : index
      %c0_22 = arith.constant 0 : index
      %20 = vector.load %arg6[%c0_21, %c0_22] : memref<8x128xf32, #tpu.memory_space<vmem>>, vector<1x128xf32>
      tpu.vector_store %arg6[%c0_21, %c0_22], %19 {strides = array<i32>} : memref<8x128xf32, #tpu.memory_space<vmem>>, vector<1x128xf32>,
      %21 = arith.mulf %12, %12 : vector<128x128xf32>
      %cst_23 = arith.constant dense<0.000000e+00> : vector<128xf32>
      %22 = vector.multi_reduction <add>, %21, %cst_23 [0] : vector<128x128xf32> to vector<128xf32>
      %23 = vector.shape_cast %22 : vector<128xf32> to vector<1x128xf32>
      %c0_24 = arith.constant 0 : index
      %c0_25 = arith.constant 0 : index
      %24 = vector.load %arg7[%c0_24, %c0_25] : memref<8x128xf32, #tpu.memory_space<vmem>>, vector<1x128xf32>
      tpu.vector_store %arg7[%c0_24, %c0_25], %23 {strides = array<i32>} : memref<8x128xf32, #tpu.memory_space<vmem>>, vector<1x128xf32>,
    } else {
    }
    return
  }
  func.func @transform_0(%arg0: i32, %arg1: i32, %arg2: i32) -> (i32, i32) {
    %c0_i32 = arith.constant 0 : i32
    return %arg0, %arg2 : i32, i32
  }
  func.func @transform_1(%arg0: i32, %arg1: i32, %arg2: i32) -> (i32, i32) {
    %c0_i32 = arith.constant 0 : i32
    return %arg2, %arg1 : i32, i32
  }
  func.func @transform_2(%arg0: i32, %arg1: i32, %arg2: i32) -> (i32, i32) {
    %c0_i32 = arith.constant 0 : i32
    return %arg0, %arg1 : i32, i32
  }
  func.func @transform_3(%arg0: i32, %arg1: i32, %arg2: i32) -> (i32, i32) {
    %c0_i32 = arith.constant 0 : i32
    return %arg0, %arg1 : i32, i32
  }
  func.func @transform_4(%arg0: i32, %arg1: i32, %arg2: i32) -> (i32, i32) {
    %c0_i32 = arith.constant 0 : i32
    return %arg0, %arg1 : i32, i32
  }
}

module attributes {stable_mosaic.version = 11 : i64} {
  func.func @_bn_relu_kernel(%arg0: i32, %arg1: memref<128x128xf32, #tpu.memory_space<vmem>>, %arg2: memref<1x128xf32, #tpu.memory_space<vmem>>, %arg3: memref<1x128xf32, #tpu.memory_space<vmem>>, %arg4: memref<128x128xf32, #tpu.memory_space<vmem>>) attributes {dimension_semantics = [#tpu.dimension_semantics<parallel>], iteration_bounds = array<i64: 1>, scalar_prefetch = 0 : i64, scratch_operands = 0 : i64, tpu.core_type = #tpu.core_type<tc>, window_params = [{transform_indices = @transform_0, window_bounds = array<i64: 128, 128>}, {pipeline_mode = #tpu.pipeline_mode<synchronous>, transform_indices = @transform_1, window_bounds = array<i64: 1, 128>}, {pipeline_mode = #tpu.pipeline_mode<synchronous>, transform_indices = @transform_2, window_bounds = array<i64: 1, 128>}, {transform_indices = @transform_3, window_bounds = array<i64: 128, 128>}]} {
    %c0 = arith.constant 0 : index
    %c0_0 = arith.constant 0 : index
    %0 = vector.load %arg1[%c0, %c0_0] : memref<128x128xf32, #tpu.memory_space<vmem>>, vector<128x128xf32>
    %c0_1 = arith.constant 0 : index
    %c0_2 = arith.constant 0 : index
    %1 = vector.load %arg2[%c0_1, %c0_2] : memref<1x128xf32, #tpu.memory_space<vmem>>, vector<1x128xf32>
    %2 = vector.broadcast %1 : vector<1x128xf32> to vector<128x128xf32>
    %3 = arith.mulf %0, %2 : vector<128x128xf32>
    %c0_3 = arith.constant 0 : index
    %c0_4 = arith.constant 0 : index
    %4 = vector.load %arg3[%c0_3, %c0_4] : memref<1x128xf32, #tpu.memory_space<vmem>>, vector<1x128xf32>
    %5 = vector.broadcast %4 : vector<1x128xf32> to vector<128x128xf32>
    %6 = arith.addf %3, %5 : vector<128x128xf32>
    %cst = arith.constant 0.000000e+00 : f32
    %7 = vector.broadcast %cst : f32 to vector<128x128xf32>
    %8 = arith.maximumf %6, %7 : vector<128x128xf32>
    %c0_5 = arith.constant 0 : index
    %c0_6 = arith.constant 0 : index
    %9 = vector.load %arg4[%c0_5, %c0_6] : memref<128x128xf32, #tpu.memory_space<vmem>>, vector<128x128xf32>
    tpu.vector_store %arg4[%c0_5, %c0_6], %8 {strides = array<i32>} : memref<128x128xf32, #tpu.memory_space<vmem>>, vector<128x128xf32>,
    return
  }
  func.func @transform_0(%arg0: i32) -> (i32, i32) {
    %c0_i32 = arith.constant 0 : i32
    %c0_i32_0 = arith.constant 0 : i32
    return %arg0, %c0_i32 : i32, i32
  }
  func.func @transform_1(%arg0: i32) -> (i32, i32) {
    %c0_i32 = arith.constant 0 : i32
    %c0_i32_0 = arith.constant 0 : i32
    %c0_i32_1 = arith.constant 0 : i32
    return %c0_i32, %c0_i32_0 : i32, i32
  }
  func.func @transform_2(%arg0: i32) -> (i32, i32) {
    %c0_i32 = arith.constant 0 : i32
    %c0_i32_0 = arith.constant 0 : i32
    %c0_i32_1 = arith.constant 0 : i32
    return %c0_i32, %c0_i32_0 : i32, i32
  }
  func.func @transform_3(%arg0: i32) -> (i32, i32) {
    %c0_i32 = arith.constant 0 : i32
    %c0_i32_0 = arith.constant 0 : i32
    return %arg0, %c0_i32 : i32, i32
  }
}

module attributes {stable_mosaic.version = 11 : i64} {
  func.func @_conv_stats_kernel(%arg0: i32, %arg1: i32, %arg2: i32, %arg3: memref<128x384xf32, #tpu.memory_space<vmem>>, %arg4: memref<384x128xf32, #tpu.memory_space<vmem>>, %arg5: memref<128x128xf32, #tpu.memory_space<vmem>>, %arg6: memref<8x128xf32, #tpu.memory_space<vmem>>, %arg7: memref<8x128xf32, #tpu.memory_space<vmem>>, %arg8: memref<128x128xf32, #tpu.memory_space<vmem>>) attributes {dimension_semantics = [#tpu.dimension_semantics<parallel>, #tpu.dimension_semantics<parallel>, #tpu.dimension_semantics<arbitrary>], iteration_bounds = array<i64: 1, 1, 3>, scalar_prefetch = 0 : i64, scratch_operands = 1 : i64, tpu.core_type = #tpu.core_type<tc>, window_params = [{transform_indices = @transform_0, window_bounds = array<i64: 128, 384>}, {transform_indices = @transform_1, window_bounds = array<i64: 384, 128>}, {transform_indices = @transform_2, window_bounds = array<i64: 128, 128>}, {transform_indices = @transform_3, window_bounds = array<i64: 8, 128>}, {transform_indices = @transform_4, window_bounds = array<i64: 8, 128>}]} {
    %c0_i32 = arith.constant 0 : i32
    %0 = arith.cmpi eq, %arg2, %c0_i32 : i32
    %1 = arith.extui %0 : i1 to i32
    %c0_i32_0 = arith.constant 0 : i32
    %2 = arith.cmpi ne, %1, %c0_i32_0 : i32
    scf.if %2 {
      %cst_9 = arith.constant 0.000000e+00 : f32
      %12 = vector.broadcast %cst_9 : f32 to vector<128x128xf32>
      %c0_10 = arith.constant 0 : index
      %c0_11 = arith.constant 0 : index
      %13 = vector.load %arg8[%c0_10, %c0_11] : memref<128x128xf32, #tpu.memory_space<vmem>>, vector<128x128xf32>
      tpu.vector_store %arg8[%c0_10, %c0_11], %12 {strides = array<i32>} : memref<128x128xf32, #tpu.memory_space<vmem>>, vector<128x128xf32>,
    } else {
    }
    %c0 = arith.constant 0 : index
    %c0_1 = arith.constant 0 : index
    %3 = vector.load %arg8[%c0, %c0_1] : memref<128x128xf32, #tpu.memory_space<vmem>>, vector<128x128xf32>
    %c0_2 = arith.constant 0 : index
    %c0_3 = arith.constant 0 : index
    %4 = vector.load %arg3[%c0_2, %c0_3] : memref<128x384xf32, #tpu.memory_space<vmem>>, vector<128x384xf32>
    %c0_4 = arith.constant 0 : index
    %c0_5 = arith.constant 0 : index
    %5 = vector.load %arg4[%c0_4, %c0_5] : memref<384x128xf32, #tpu.memory_space<vmem>>, vector<384x128xf32>
    %cst = arith.constant dense<0.000000e+00> : vector<128x128xf32>
    %6 = tpu.matmul %4, %5, %cst {dimension_numbers = #tpu.dot_dimension_numbers<[1], [0], [0], [1], [0, 0, 1, 1], [], []>} : vector<128x384xf32>, vector<384x128xf32>, vector<128x128xf32> -> vector<128x128xf32>
    %7 = arith.addf %3, %6 : vector<128x128xf32>
    %c0_6 = arith.constant 0 : index
    %c0_7 = arith.constant 0 : index
    %8 = vector.load %arg8[%c0_6, %c0_7] : memref<128x128xf32, #tpu.memory_space<vmem>>, vector<128x128xf32>
    tpu.vector_store %arg8[%c0_6, %c0_7], %7 {strides = array<i32>} : memref<128x128xf32, #tpu.memory_space<vmem>>, vector<128x128xf32>,
    %c2_i32 = arith.constant 2 : i32
    %9 = arith.cmpi eq, %arg2, %c2_i32 : i32
    %10 = arith.extui %9 : i1 to i32
    %c0_i32_8 = arith.constant 0 : i32
    %11 = arith.cmpi ne, %10, %c0_i32_8 : i32
    scf.if %11 {
      %c0_9 = arith.constant 0 : index
      %c0_10 = arith.constant 0 : index
      %12 = vector.load %arg8[%c0_9, %c0_10] : memref<128x128xf32, #tpu.memory_space<vmem>>, vector<128x128xf32>
      %c0_11 = arith.constant 0 : index
      %c0_12 = arith.constant 0 : index
      %13 = vector.load %arg5[%c0_11, %c0_12] : memref<128x128xf32, #tpu.memory_space<vmem>>, vector<128x128xf32>
      tpu.vector_store %arg5[%c0_11, %c0_12], %12 {strides = array<i32>} : memref<128x128xf32, #tpu.memory_space<vmem>>, vector<128x128xf32>,
      %cst_13 = arith.constant 0.000000e+00 : f32
      %14 = vector.broadcast %cst_13 : f32 to vector<8x128xf32>
      %c0_14 = arith.constant 0 : index
      %c0_15 = arith.constant 0 : index
      %15 = vector.load %arg6[%c0_14, %c0_15] : memref<8x128xf32, #tpu.memory_space<vmem>>, vector<8x128xf32>
      tpu.vector_store %arg6[%c0_14, %c0_15], %14 {strides = array<i32>} : memref<8x128xf32, #tpu.memory_space<vmem>>, vector<8x128xf32>,
      %cst_16 = arith.constant 0.000000e+00 : f32
      %16 = vector.broadcast %cst_16 : f32 to vector<8x128xf32>
      %c0_17 = arith.constant 0 : index
      %c0_18 = arith.constant 0 : index
      %17 = vector.load %arg7[%c0_17, %c0_18] : memref<8x128xf32, #tpu.memory_space<vmem>>, vector<8x128xf32>
      tpu.vector_store %arg7[%c0_17, %c0_18], %16 {strides = array<i32>} : memref<8x128xf32, #tpu.memory_space<vmem>>, vector<8x128xf32>,
      %cst_19 = arith.constant dense<0.000000e+00> : vector<128xf32>
      %18 = vector.multi_reduction <add>, %12, %cst_19 [0] : vector<128x128xf32> to vector<128xf32>
      %19 = vector.shape_cast %18 : vector<128xf32> to vector<1x128xf32>
      %c0_20 = arith.constant 0 : index
      %c0_21 = arith.constant 0 : index
      %20 = vector.load %arg6[%c0_20, %c0_21] : memref<8x128xf32, #tpu.memory_space<vmem>>, vector<1x128xf32>
      tpu.vector_store %arg6[%c0_20, %c0_21], %19 {strides = array<i32>} : memref<8x128xf32, #tpu.memory_space<vmem>>, vector<1x128xf32>,
      %21 = arith.mulf %12, %12 : vector<128x128xf32>
      %cst_22 = arith.constant dense<0.000000e+00> : vector<128xf32>
      %22 = vector.multi_reduction <add>, %21, %cst_22 [0] : vector<128x128xf32> to vector<128xf32>
      %23 = vector.shape_cast %22 : vector<128xf32> to vector<1x128xf32>
      %c0_23 = arith.constant 0 : index
      %c0_24 = arith.constant 0 : index
      %24 = vector.load %arg7[%c0_23, %c0_24] : memref<8x128xf32, #tpu.memory_space<vmem>>, vector<1x128xf32>
      tpu.vector_store %arg7[%c0_23, %c0_24], %23 {strides = array<i32>} : memref<8x128xf32, #tpu.memory_space<vmem>>, vector<1x128xf32>,
    } else {
    }
    return
  }
  func.func @transform_0(%arg0: i32, %arg1: i32, %arg2: i32) -> (i32, i32) {
    %c0_i32 = arith.constant 0 : i32
    return %arg0, %arg2 : i32, i32
  }
  func.func @transform_1(%arg0: i32, %arg1: i32, %arg2: i32) -> (i32, i32) {
    %c0_i32 = arith.constant 0 : i32
    return %arg2, %arg1 : i32, i32
  }
  func.func @transform_2(%arg0: i32, %arg1: i32, %arg2: i32) -> (i32, i32) {
    %c0_i32 = arith.constant 0 : i32
    return %arg0, %arg1 : i32, i32
  }
  func.func @transform_3(%arg0: i32, %arg1: i32, %arg2: i32) -> (i32, i32) {
    %c0_i32 = arith.constant 0 : i32
    return %arg0, %arg1 : i32, i32
  }
  func.func @transform_4(%arg0: i32, %arg1: i32, %arg2: i32) -> (i32, i32) {
    %c0_i32 = arith.constant 0 : i32
    return %arg0, %arg1 : i32, i32
  }
}

module attributes {stable_mosaic.version = 11 : i64} {
  func.func @_bn_shortcut_relu_kernel(%arg0: i32, %arg1: memref<128x128xf32, #tpu.memory_space<vmem>>, %arg2: memref<128x128xf32, #tpu.memory_space<vmem>>, %arg3: memref<128x128xf32, #tpu.memory_space<vmem>>, %arg4: memref<1x128xf32, #tpu.memory_space<vmem>>, %arg5: memref<1x128xf32, #tpu.memory_space<vmem>>, %arg6: memref<1x128xf32, #tpu.memory_space<vmem>>, %arg7: memref<128x128xf32, #tpu.memory_space<vmem>>) attributes {dimension_semantics = [#tpu.dimension_semantics<parallel>], iteration_bounds = array<i64: 1>, scalar_prefetch = 0 : i64, scratch_operands = 0 : i64, tpu.core_type = #tpu.core_type<tc>, window_params = [{transform_indices = @transform_0, window_bounds = array<i64: 128, 128>}, {transform_indices = @transform_1, window_bounds = array<i64: 128, 128>}, {pipeline_mode = #tpu.pipeline_mode<synchronous>, transform_indices = @transform_2, window_bounds = array<i64: 128, 128>}, {pipeline_mode = #tpu.pipeline_mode<synchronous>, transform_indices = @transform_3, window_bounds = array<i64: 1, 128>}, {pipeline_mode = #tpu.pipeline_mode<synchronous>, transform_indices = @transform_4, window_bounds = array<i64: 1, 128>}, {pipeline_mode = #tpu.pipeline_mode<synchronous>, transform_indices = @transform_5, window_bounds = array<i64: 1, 128>}, {transform_indices = @transform_6, window_bounds = array<i64: 128, 128>}]} {
    %c0 = arith.constant 0 : index
    %c0_0 = arith.constant 0 : index
    %0 = vector.load %arg2[%c0, %c0_0] : memref<128x128xf32, #tpu.memory_space<vmem>>, vector<128x128xf32>
    %c0_1 = arith.constant 0 : index
    %c0_2 = arith.constant 0 : index
    %1 = vector.load %arg3[%c0_1, %c0_2] : memref<128x128xf32, #tpu.memory_space<vmem>>, vector<128x128xf32>
    %cst = arith.constant dense<0.000000e+00> : vector<128x128xf32>
    %2 = tpu.matmul %0, %1, %cst {dimension_numbers = #tpu.dot_dimension_numbers<[1], [0], [0], [1], [0, 0, 1, 1], [], []>} : vector<128x128xf32>, vector<128x128xf32>, vector<128x128xf32> -> vector<128x128xf32>
    %c0_3 = arith.constant 0 : index
    %c0_4 = arith.constant 0 : index
    %3 = vector.load %arg4[%c0_3, %c0_4] : memref<1x128xf32, #tpu.memory_space<vmem>>, vector<1x128xf32>
    %4 = vector.broadcast %3 : vector<1x128xf32> to vector<128x128xf32>
    %5 = arith.addf %2, %4 : vector<128x128xf32>
    %c0_5 = arith.constant 0 : index
    %c0_6 = arith.constant 0 : index
    %6 = vector.load %arg1[%c0_5, %c0_6] : memref<128x128xf32, #tpu.memory_space<vmem>>, vector<128x128xf32>
    %c0_7 = arith.constant 0 : index
    %c0_8 = arith.constant 0 : index
    %7 = vector.load %arg5[%c0_7, %c0_8] : memref<1x128xf32, #tpu.memory_space<vmem>>, vector<1x128xf32>
    %8 = vector.broadcast %7 : vector<1x128xf32> to vector<128x128xf32>
    %9 = arith.mulf %6, %8 : vector<128x128xf32>
    %c0_9 = arith.constant 0 : index
    %c0_10 = arith.constant 0 : index
    %10 = vector.load %arg6[%c0_9, %c0_10] : memref<1x128xf32, #tpu.memory_space<vmem>>, vector<1x128xf32>
    %11 = vector.broadcast %10 : vector<1x128xf32> to vector<128x128xf32>
    %12 = arith.addf %9, %11 : vector<128x128xf32>
    %13 = arith.addf %12, %5 : vector<128x128xf32>
    %cst_11 = arith.constant 0.000000e+00 : f32
    %14 = vector.broadcast %cst_11 : f32 to vector<128x128xf32>
    %15 = arith.maximumf %13, %14 : vector<128x128xf32>
    %c0_12 = arith.constant 0 : index
    %c0_13 = arith.constant 0 : index
    %16 = vector.load %arg7[%c0_12, %c0_13] : memref<128x128xf32, #tpu.memory_space<vmem>>, vector<128x128xf32>
    tpu.vector_store %arg7[%c0_12, %c0_13], %15 {strides = array<i32>} : memref<128x128xf32, #tpu.memory_space<vmem>>, vector<128x128xf32>,
    return
  }
  func.func @transform_0(%arg0: i32) -> (i32, i32) {
    %c0_i32 = arith.constant 0 : i32
    %c0_i32_0 = arith.constant 0 : i32
    return %arg0, %c0_i32 : i32, i32
  }
  func.func @transform_1(%arg0: i32) -> (i32, i32) {
    %c0_i32 = arith.constant 0 : i32
    %c0_i32_0 = arith.constant 0 : i32
    return %arg0, %c0_i32 : i32, i32
  }
  func.func @transform_2(%arg0: i32) -> (i32, i32) {
    %c0_i32 = arith.constant 0 : i32
    %c0_i32_0 = arith.constant 0 : i32
    %c0_i32_1 = arith.constant 0 : i32
    return %c0_i32, %c0_i32_0 : i32, i32
  }
  func.func @transform_3(%arg0: i32) -> (i32, i32) {
    %c0_i32 = arith.constant 0 : i32
    %c0_i32_0 = arith.constant 0 : i32
    %c0_i32_1 = arith.constant 0 : i32
    return %c0_i32, %c0_i32_0 : i32, i32
  }
  func.func @transform_4(%arg0: i32) -> (i32, i32) {
    %c0_i32 = arith.constant 0 : i32
    %c0_i32_0 = arith.constant 0 : i32
    %c0_i32_1 = arith.constant 0 : i32
    return %c0_i32, %c0_i32_0 : i32, i32
  }
  func.func @transform_5(%arg0: i32) -> (i32, i32) {
    %c0_i32 = arith.constant 0 : i32
    %c0_i32_0 = arith.constant 0 : i32
    %c0_i32_1 = arith.constant 0 : i32
    return %c0_i32, %c0_i32_0 : i32, i32
  }
  func.func @transform_6(%arg0: i32) -> (i32, i32) {
    %c0_i32 = arith.constant 0 : i32
    %c0_i32_0 = arith.constant 0 : i32
    return %arg0, %c0_i32 : i32, i32
  }
}

</mosaic_0001>

<bundles_post_ra>
// kernel: residual_forward.5
= control target key start
LH: loop header
LB: loop body
LE: loop exit
PB: predicated region body
PF: predicated region fallthrough
CT: control target
= control target key end

     0   :  { %s254_s0 = inlined_call_operand.vmem [shape: f32[128,128], index: 0, kind: input, shape index: {}]   ;;  %s255_s1 = inlined_call_operand.vmem [shape: f32[1,128], index: 1, kind: input, shape index: {}]   ;;  %s256_s2 = inlined_call_operand.vmem [shape: f32[1,128], index: 2, kind: input, shape index: {}]   ;;  %s257_s3 = inlined_call_operand.vmem [shape: f32[128,128], index: 3, kind: output, shape index: {}]  }
   0x1   :  { %v14_v0 = vld [vmem:[%s254_s0] sm:$0xff]  ;;  %v15_v4 = vld [vmem:[%s254_s0 + $0x8] sm:$0xff]  ;;  %v16_v5 = vld [vmem:[%s254_s0 + $0x10] sm:$0xff] }
   0x2   :  { %v112_v1 = vld [vmem:[%s255_s1] ss:$0 sm:$0xff]  ;;  %v17_v6 = vld [vmem:[%s254_s0 + $0x18] sm:$0xff]  ;;  %v19_v11 = vld [vmem:[%s254_s0 + $0x28] sm:$0xff] }
   0x3   :  { %v143_v2 = vld [vmem:[%s256_s2] ss:$0 sm:$0xff]  ;;  %v37_v3 = vmul.f32 %v112_v1, %v14_v0  ;;  %v38_v7 = vmul.f32 %v112_v1, %v15_v4  ;;  %v39_v8 = vmul.f32 %v112_v1, %v16_v5  ;;  %v40_v9 = vmul.f32 %v112_v1, %v17_v6  ;;  %v20_v12 = vld [vmem:[%s254_s0 + $0x30] sm:$0xff]  ;;  %v21_v17 = vld [vmem:[%s254_s0 + $0x38] sm:$0xff] }
   0x4   :  { %v18_v10 = vld [vmem:[%s254_s0 + $0x20] sm:$0xff]  ;;  %v42_v15 = vmul.f32 %v112_v1, %v19_v11  ;;  %v43_v16 = vmul.f32 %v112_v1, %v20_v12  ;;  %v44_v21 = vmul.f32 %v112_v1, %v21_v17  ;;  %v23_v27 = vld [vmem:[%s254_s0 + $0x48] sm:$0xff]  ;;  %v24_v28 = vld [vmem:[%s254_s0 + $0x50] sm:$0xff] }
   0x5   :  { %v60_v13 = vadd.f32 %v143_v2, %v37_v3  ;;  %v41_v14 = vmul.f32 %v112_v1, %v18_v10  ;;  %v61_v18 = vadd.f32 %v143_v2, %v38_v7  ;;  %v62_v19 = vadd.f32 %v143_v2, %v39_v8  ;;  %v22_v22 = vld [vmem:[%s254_s0 + $0x40] sm:$0xff]  ;;  %v25_v29 = vld [vmem:[%s254_s0 + $0x58] sm:$0xff]  ;;  %v27_v35 = vld [vmem:[%s254_s0 + $0x68] sm:$0xff] }
   0x6   :  { %v63_v20 = vadd.f32 %v143_v2, %v40_v9  ;;  %v65_v25 = vadd.f32 %v143_v2, %v42_v15  ;;  %v66_v26 = vadd.f32 %v143_v2, %v43_v16  ;;  %v67_v33 = vadd.f32 %v143_v2, %v44_v21  ;;  %v26_v34 = vld [vmem:[%s254_s0 + $0x60] sm:$0xff]  ;;  %v28_v36 = vld [vmem:[%s254_s0 + $0x70] sm:$0xff]  ;;  %v29_v41 = vld [vmem:[%s254_s0 + $0x78] sm:$0xff] }
   0x7   :  { %v76_v23 = vmax.f32 %v60_v13, 0.0  ;;  %v64_v24 = vadd.f32 %v143_v2, %v41_v14  ;;  %v77_v30 = vmax.f32 %v61_v18, 0.0  ;;  %v78_v31 = vmax.f32 %v62_v19, 0.0 }
   0x8   :  { %v79_v32 = vmax.f32 %v63_v20, 0.0  ;;  %v81_v38 = vmax.f32 %v65_v25, 0.0  ;;  %v82_v39 = vmax.f32 %v66_v26, 0.0  ;;  %v45_v40 = vmul.f32 %v112_v1, %v22_v22 }
   0x9   :  { %92 = vst [vmem:[%s257_s3] sm:$0xff] %v76_v23  ;;  %v80_v37 = vmax.f32 %v64_v24, 0.0  ;;  %93 = vst [vmem:[%s257_s3 + $0x8] sm:$0xff] %v77_v30  ;;  %v83_v42 = vmax.f32 %v67_v33, 0.0  ;;  %v46_v43 = vmul.f32 %v112_v1, %v23_v27  ;;  %v47_v44 = vmul.f32 %v112_v1, %v24_v28 }
   0xa   :  { %94 = vst [vmem:[%s257_s3 + $0x10] sm:$0xff] %v78_v31  ;;  %95 = vst [vmem:[%s257_s3 + $0x18] sm:$0xff] %v79_v32  ;;  %v48_v45 = vmul.f32 %v112_v1, %v25_v29  ;;  %v68_v46 = vadd.f32 %v143_v2, %v45_v40  ;;  %v49_v47 = vmul.f32 %v112_v1, %v26_v34 }
   0xb   :  { %96 = vst [vmem:[%s257_s3 + $0x20] sm:$0xff] %v80_v37  ;;  %97 = vst [vmem:[%s257_s3 + $0x28] sm:$0xff] %v81_v38  ;;  %v50_v48 = vmul.f32 %v112_v1, %v27_v35  ;;  %v51_v49 = vmul.f32 %v112_v1, %v28_v36  ;;  %v69_v50 = vadd.f32 %v143_v2, %v46_v43 }
   0xc   :  { %98 = vst [vmem:[%s257_s3 + $0x30] sm:$0xff] %v82_v39  ;;  %99 = vst [vmem:[%s257_s3 + $0x38] sm:$0xff] %v83_v42  ;;  %v70_v51 = vadd.f32 %v143_v2, %v47_v44  ;;  %v71_v52 = vadd.f32 %v143_v2, %v48_v45  ;;  %v52_v53 = vmul.f32 %v112_v1, %v29_v41  ;;  %v84_v54 = vmax.f32 %v68_v46, 0.0 }
   0xd   :  { %v72_v55 = vadd.f32 %v143_v2, %v49_v47  ;;  %v73_v56 = vadd.f32 %v143_v2, %v50_v48  ;;  %v74_v57 = vadd.f32 %v143_v2, %v51_v49  ;;  %v85_v58 = vmax.f32 %v69_v50, 0.0 }
   0xe   :  { %v86_v59 = vmax.f32 %v70_v51, 0.0  ;;  %v87_v60 = vmax.f32 %v71_v52, 0.0  ;;  %v75_v61 = vadd.f32 %v143_v2, %v52_v53  ;;  %100 = vst [vmem:[%s257_s3 + $0x40] sm:$0xff] %v84_v54 }
   0xf   :  { %v88_v62 = vmax.f32 %v72_v55, 0.0  ;;  %v89_v63 = vmax.f32 %v73_v56, 0.0  ;;  %v90_v0 = vmax.f32 %v74_v57, 0.0  ;;  %101 = vst [vmem:[%s257_s3 + $0x48] sm:$0xff] %v85_v58 }
  0x10   :  { %102 = vst [vmem:[%s257_s3 + $0x50] sm:$0xff] %v86_v59  ;;  %103 = vst [vmem:[%s257_s3 + $0x58] sm:$0xff] %v87_v60  ;;  %v91_v1 = vmax.f32 %v75_v61, 0.0 }
  0x11   :  { %104 = vst [vmem:[%s257_s3 + $0x60] sm:$0xff] %v88_v62  ;;  %105 = vst [vmem:[%s257_s3 + $0x68] sm:$0xff] %v89_v63 }
  0x12   :  { %106 = vst [vmem:[%s257_s3 + $0x70] sm:$0xff] %v90_v0  ;;  %107 = vst [vmem:[%s257_s3 + $0x78] sm:$0xff] %v91_v1 }

// kernel: residual_forward.4
= control target key start
LH: loop header
LB: loop body
LE: loop exit
PB: predicated region body
PF: predicated region fallthrough
CT: control target
= control target key end

     0   :  { %v505_v40 = vmov 0.0   ;;  %s687_s1 = inlined_call_operand.vmem [shape: f32[128,128], index: 1, kind: input, shape index: {}]   ;;  %s688_s0 = inlined_call_operand.vmem [shape: f32[128,128], index: 0, kind: input, shape index: {}]   ;;  %s689_s3 = inlined_call_operand.vmem [shape: f32[8,128], index: 3, kind: output, shape index: {1}]   ;;  %s690_s4 = inlined_call_operand.vmem [shape: f32[8,128], index: 4, kind: output, shape index: {2}]   ;;  %s691_s2 = inlined_call_operand.vmem [shape: f32[128,128], index: 2, kind: output, shape index: {0}]  }
   0x1   :  { %v66_v0 = vld [vmem:[%s687_s1] sm:$0xff]  ;;  %v67_v1 = vld [vmem:[%s687_s1 + $0x8] sm:$0xff]  ;;  %v68_v2 = vld [vmem:[%s687_s1 + $0x10] sm:$0xff]  ;;  %294 = vst [vmem:[%s689_s3] sm:$0xff] %v505_v40 }
   0x2   :  { %v456_v3 = vpack.c.bf16 %v67_v1, %v66_v0  ;;  %v69_v4 = vld [vmem:[%s687_s1 + $0x18] sm:$0xff]  ;;  %v70_v6 = vld [vmem:[%s687_s1 + $0x20] sm:$0xff]  ;;  %v71_v7 = vld [vmem:[%s687_s1 + $0x28] sm:$0xff]  ;;  %295 = vst [vmem:[%s690_s4] sm:$0xff] %v505_v40 }
   0x3   :  { %v460_v5 = vpack.c.bf16 %v69_v4, %v68_v2  ;;  %v464_v8 = vpack.c.bf16 %v71_v7, %v70_v6  ;;  %v50_v9 = vld [vmem:[%s688_s0] sm:$0xff]  ;;  %v72_v10 = vld [vmem:[%s687_s1 + $0x30] sm:$0xff]  ;;  %v73_v11 = vld [vmem:[%s687_s1 + $0x38] sm:$0xff] }
   0x4   :  { %457 = vmatprep.subr.bf16.mxu0 %v456_v3  ;;  %488 = vmatprep.subr.bf16.mxu1 %v456_v3  ;;  %v58_v12 = vld [vmem:[%s688_s0 + $0x40] sm:$0xff]  ;;  %v468_v13 = vpack.c.bf16 %v73_v11, %v72_v10  ;;  %v75_v15 = vld [vmem:[%s687_s1 + $0x48] sm:$0xff]  ;;  %v76_v17 = vld [vmem:[%s687_s1 + $0x50] sm:$0xff] }
   0x5   :  { %459 = vmatpush3.bf16.msra.mxu0 %v456_v3  ;;  %496 = vmatpush3.bf16.msra.mxu1 %v456_v3  ;;  %v74_v14 = vld [vmem:[%s687_s1 + $0x40] sm:$0xff]  ;;  %v77_v18 = vld [vmem:[%s687_s1 + $0x58] sm:$0xff]  ;;  %v79_v21 = vld [vmem:[%s687_s1 + $0x68] sm:$0xff] }
   0x6   :  { %461 = vmatprep.subr.bf16.mxu0 %v460_v5  ;;  %489 = vmatprep.subr.bf16.mxu1 %v460_v5  ;;  %v472_v16 = vpack.c.bf16 %v75_v15, %v74_v14  ;;  %v476_v19 = vpack.c.bf16 %v77_v18, %v76_v17  ;;  %v78_v20 = vld [vmem:[%s687_s1 + $0x60] sm:$0xff]  ;;  %v80_v23 = vld [vmem:[%s687_s1 + $0x70] sm:$0xff]  ;;  %v81_v24 = vld [vmem:[%s687_s1 + $0x78] sm:$0xff] }
   0x7   :  { %432 = vmatprep.mubr.f32.mxu0 %v50_v9  ;;  %444 = vmatprep.mubr.f32.mxu1 %v58_v12  ;;  %v480_v22 = vpack.c.bf16 %v79_v21, %v78_v20  ;;  %v484_v25 = vpack.c.bf16 %v81_v24, %v80_v23  ;;  %v51_v26 = vld [vmem:[%s688_s0 + $0x8] sm:$0xff]  ;;  %v52_v28 = vld [vmem:[%s688_s0 + $0x10] sm:$0xff]  ;;  %v53_v30 = vld [vmem:[%s688_s0 + $0x18] sm:$0xff] }
   0x8   :  { %v59_v27 = vld [vmem:[%s688_s0 + $0x48] sm:$0xff]  ;;  %v60_v29 = vld [vmem:[%s688_s0 + $0x50] sm:$0xff]  ;;  %v61_v31 = vld [vmem:[%s688_s0 + $0x58] sm:$0xff] }
   0x9   :  { %463 = vmatpush3.bf16.msra.mxu0 %v460_v5  ;;  %497 = vmatpush3.bf16.msra.mxu1 %v460_v5  ;;  %v54_v32 = vld [vmem:[%s688_s0 + $0x20] sm:$0xff]  ;;  %v55_v34 = vld [vmem:[%s688_s0 + $0x28] sm:$0xff]  ;;  %v56_v36 = vld [vmem:[%s688_s0 + $0x30] sm:$0xff] }
   0xa   :  { %465 = vmatprep.subr.bf16.mxu0 %v464_v8  ;;  %490 = vmatprep.subr.bf16.mxu1 %v464_v8  ;;  %v62_v33 = vld [vmem:[%s688_s0 + $0x60] sm:$0xff]  ;;  %v63_v35 = vld [vmem:[%s688_s0 + $0x68] sm:$0xff]  ;;  %v64_v37 = vld [vmem:[%s688_s0 + $0x70] sm:$0xff] }
   0xb   :  { %v57_v38 = vld [vmem:[%s688_s0 + $0x38] sm:$0xff] }
   0xc   :  { %v65_v39 = vld [vmem:[%s688_s0 + $0x78] sm:$0xff] }
   0xd   :  { %467 = vmatpush3.bf16.msra.mxu0 %v464_v8  ;;  %498 = vmatpush3.bf16.msra.mxu1 %v464_v8 }
   0xe   :  { %469 = vmatprep.subr.bf16.mxu0 %v468_v13  ;;  %491 = vmatprep.subr.bf16.mxu1 %v468_v13 }
  0x11   :  { %471 = vmatpush3.bf16.msra.mxu0 %v468_v13  ;;  %499 = vmatpush3.bf16.msra.mxu1 %v468_v13 }
  0x12   :  { %473 = vmatprep.subr.bf16.mxu0 %v472_v16  ;;  %492 = vmatprep.subr.bf16.mxu1 %v472_v16 }
  0x15   :  { %475 = vmatpush3.bf16.msra.mxu0 %v472_v16  ;;  %500 = vmatpush3.bf16.msra.mxu1 %v472_v16 }
  0x16   :  { %477 = vmatprep.subr.bf16.mxu0 %v476_v19  ;;  %493 = vmatprep.subr.bf16.mxu1 %v476_v19 }
  0x19   :  { %479 = vmatpush3.bf16.msra.mxu0 %v476_v19  ;;  %501 = vmatpush3.bf16.msra.mxu1 %v476_v19 }
  0x1a   :  { %481 = vmatprep.subr.bf16.mxu0 %v480_v22  ;;  %494 = vmatprep.subr.bf16.mxu1 %v480_v22 }
  0x1d   :  { %483 = vmatpush3.bf16.msra.mxu0 %v480_v22  ;;  %502 = vmatpush3.bf16.msra.mxu1 %v480_v22 }
  0x1e   :  { %485 = vmatprep.subr.bf16.mxu0 %v484_v25  ;;  %495 = vmatprep.subr.bf16.mxu1 %v484_v25 }
  0x21   :  { %487 = vmatpush3.bf16.msra.mxu0 %v484_v25  ;;  %503 = vmatpush3.bf16.msra.mxu1 %v484_v25 }
  0x24   :  { %433 = vmatmul.mubr.f32.vlgmr.msra.gmra.mrb[0].mxu0 %v51_v26  ;;  %445 = vmatmul.mubr.f32.vlgmr.msra.gmra.mrb[0].mxu1 %v59_v27 }
  0x25   :  { %435 = vmatprep.mubr.f32.mxu0 %v52_v28  ;;  %447 = vmatprep.mubr.f32.mxu1 %v60_v29 }
  0x28   :  { %436 = vmatmul.mubr.f32.gmra.mrb[2].mxu0 %v53_v30  ;;  %448 = vmatmul.mubr.f32.gmra.mrb[2].mxu1 %v61_v31 }
  0x29   :  { %438 = vmatprep.mubr.f32.mxu0 %v54_v32  ;;  %450 = vmatprep.mubr.f32.mxu1 %v62_v33 }
  0x2c   :  { %439 = vmatmul.mubr.f32.gmra.mrb[4].mxu0 %v55_v34  ;;  %451 = vmatmul.mubr.f32.gmra.mrb[4].mxu1 %v63_v35 }
  0x2d   :  { %441 = vmatprep.mubr.f32.mxu0 %v56_v36  ;;  %453 = vmatprep.mubr.f32.mxu1 %v64_v37 }
  0x30   :  { %442 = vmatmul.mubr.f32.gmra.mrb[6].mxu0 %v57_v38  ;;  %454 = vmatmul.mubr.f32.gmra.mrb[6].mxu1 %v65_v39 }
  0xf7   :  { %v434_v41 = vpop.f32.mrb[0].mxu0  ;;  %v446_v42 = vpop.f32.mrb[0].mxu1 }
  0xf8   :  { %279 = vst [vmem:[%s691_s2 + $0x8] sm:$0xff] %v434_v41  ;;  %v319_v43 = vmul.f32 %v434_v41, %v434_v41  ;;  %v148_v44 = vpop.f32.mrb[1].mxu0  ;;  %287 = vst [vmem:[%s691_s2 + $0x48] sm:$0xff] %v446_v42  ;;  %v188_v45 = vpop.f32.mrb[1].mxu1  ;;  %v327_v17 = vmul.f32 %v446_v42, %v446_v42 }
  0xf9   :  { %278 = vst [vmem:[%s691_s2] sm:$0xff] %v148_v44  ;;  %v296_v46 = vadd.f32 %v434_v41, %v148_v44  ;;  %v318_v47 = vmul.f32 %v148_v44, %v148_v44  ;;  %286 = vst [vmem:[%s691_s2 + $0x40] sm:$0xff] %v188_v45  ;;  %v326_v14 = vmul.f32 %v188_v45, %v188_v45 }
  0xfb   :  { %v334_v48 = vadd.f32 %v319_v43, %v318_v47  ;;  %v437_v49 = vpop.f32.mrb[2].mxu0  ;;  %v449_v50 = vpop.f32.mrb[2].mxu1 }
  0xfc   :  { %281 = vst [vmem:[%s691_s2 + $0x18] sm:$0xff] %v437_v49  ;;  %v158_v51 = vpop.f32.mrb[3].mxu0  ;;  %289 = vst [vmem:[%s691_s2 + $0x58] sm:$0xff] %v449_v50  ;;  %v198_v52 = vpop.f32.mrb[3].mxu1  ;;  %v321_v55 = vmul.f32 %v437_v49, %v437_v49  ;;  %v329_v23 = vmul.f32 %v449_v50, %v449_v50 }
  0xfd   :  { %280 = vst [vmem:[%s691_s2 + $0x10] sm:$0xff] %v158_v51  ;;  %v297_v53 = vadd.f32 %v296_v46, %v158_v51  ;;  %v320_v54 = vmul.f32 %v158_v51, %v158_v51  ;;  %288 = vst [vmem:[%s691_s2 + $0x50] sm:$0xff] %v198_v52  ;;  %v328_v20 = vmul.f32 %v198_v52, %v198_v52 }
  0xff   :  { %v335_v56 = vadd.f32 %v334_v48, %v320_v54  ;;  %v440_v57 = vpop.f32.mrb[4].mxu0  ;;  %v298_v58 = vadd.f32 %v437_v49, %v297_v53  ;;  %v452_v59 = vpop.f32.mrb[4].mxu1 }
 0x100   :  { %283 = vst [vmem:[%s691_s2 + $0x28] sm:$0xff] %v440_v57  ;;  %v168_v60 = vpop.f32.mrb[5].mxu0  ;;  %291 = vst [vmem:[%s691_s2 + $0x68] sm:$0xff] %v452_v59  ;;  %v208_v61 = vpop.f32.mrb[5].mxu1  ;;  %v323_v1 = vmul.f32 %v440_v57, %v440_v57  ;;  %v331_v29 = vmul.f32 %v452_v59, %v452_v59 }
 0x101   :  { %282 = vst [vmem:[%s691_s2 + $0x20] sm:$0xff] %v168_v60  ;;  %v299_v62 = vadd.f32 %v298_v58, %v168_v60  ;;  %v322_v63 = vmul.f32 %v168_v60, %v168_v60  ;;  %v336_v0 = vadd.f32 %v335_v56, %v321_v55  ;;  %290 = vst [vmem:[%s691_s2 + $0x60] sm:$0xff] %v208_v61 }
 0x102   :  { %v330_v26 = vmul.f32 %v208_v61, %v208_v61 }
 0x103   :  { %v337_v2 = vadd.f32 %v336_v0, %v322_v63  ;;  %v443_v3 = vpop.f32.mrb[6].mxu0  ;;  %v300_v4 = vadd.f32 %v440_v57, %v299_v62  ;;  %v455_v5 = vpop.f32.mrb[6].mxu1 }
 0x104   :  { %285 = vst [vmem:[%s691_s2 + $0x38] sm:$0xff] %v443_v3  ;;  %v178_v6 = vpop.f32.mrb[7].mxu0  ;;  %293 = vst [vmem:[%s691_s2 + $0x78] sm:$0xff] %v455_v5  ;;  %v218_v7 = vpop.f32.mrb[7].mxu1  ;;  %v325_v11 = vmul.f32 %v443_v3, %v443_v3  ;;  %v333_v35 = vmul.f32 %v455_v5, %v455_v5 }
 0x105   :  { %284 = vst [vmem:[%s691_s2 + $0x30] sm:$0xff] %v178_v6  ;;  %v301_v8 = vadd.f32 %v300_v4, %v178_v6  ;;  %v324_v9 = vmul.f32 %v178_v6, %v178_v6  ;;  %v338_v10 = vadd.f32 %v337_v2, %v323_v1  ;;  %292 = vst [vmem:[%s691_s2 + $0x70] sm:$0xff] %v218_v7 }
 0x106   :  { %v332_v32 = vmul.f32 %v218_v7, %v218_v7 }
 0x107   :  { %v302_v12 = vadd.f32 %v443_v3, %v301_v8  ;;  %v339_v13 = vadd.f32 %v338_v10, %v324_v9 }
 0x109   :  { %v340_v15 = vadd.f32 %v339_v13, %v325_v11  ;;  %v303_v16 = vadd.f32 %v302_v12, %v188_v45 }
 0x10b   :  { %v341_v18 = vadd.f32 %v340_v15, %v326_v14  ;;  %v304_v19 = vadd.f32 %v446_v42, %v303_v16 }
 0x10d   :  { %v305_v21 = vadd.f32 %v304_v19, %v198_v52  ;;  %v342_v22 = vadd.f32 %v341_v18, %v327_v17 }
 0x10f   :  { %v343_v24 = vadd.f32 %v342_v22, %v328_v20  ;;  %v306_v25 = vadd.f32 %v449_v50, %v305_v21 }
 0x111   :  { %v307_v27 = vadd.f32 %v306_v25, %v208_v61  ;;  %v344_v28 = vadd.f32 %v343_v24, %v329_v23 }
 0x113   :  { %v345_v30 = vadd.f32 %v344_v28, %v330_v26  ;;  %v308_v31 = vadd.f32 %v452_v59, %v307_v27 }
 0x115   :  { %v309_v33 = vadd.f32 %v308_v31, %v218_v7  ;;  %v346_v34 = vadd.f32 %v345_v30, %v331_v29 }
 0x117   :  { %v310_v36 = vadd.f32 %v455_v5, %v309_v33  ;;  %v347_v37 = vadd.f32 %v346_v34, %v332_v32 }
 0x119   :  { %v311_v38 = vrot.slane %v310_v36, 4  ;;  %v348_v39 = vadd.f32 %v347_v37, %v333_v35 }
 0x11b   :  { %v312_v40 = vadd.f32 %v311_v38, %v310_v36  ;;  %v349_v41 = vrot.slane %v348_v39, 4 }
 0x11d   :  { %v313_v42 = vrot.slane %v312_v40, 2  ;;  %v350_v43 = vadd.f32 %v349_v41, %v348_v39 }
 0x11f   :  { %v314_v44 = vadd.f32 %v313_v42, %v312_v40  ;;  %v351_v45 = vrot.slane %v350_v43, 2 }
 0x121   :  { %v315_v46 = vrot.slane %v314_v44, 1  ;;  %v352_v47 = vadd.f32 %v351_v45, %v350_v43 }
 0x123   :  { %v316_v48 = vadd.f32 %v315_v46, %v314_v44  ;;  %v353_v49 = vrot.slane %v352_v47, 1 }
 0x125   :  { %317 = vst [vmem:[%s689_s3] sm:$0x1] %v316_v48  ;;  %v354_v50 = vadd.f32 %v353_v49, %v352_v47 }
 0x127   :  { %355 = vst [vmem:[%s690_s4] sm:$0x1] %v354_v50 }

// kernel: residual_forward.6
= control target key start
LH: loop header
LB: loop body
LE: loop exit
PB: predicated region body
PF: predicated region fallthrough
CT: control target
= control target key end

     0   :  { %s1502_s15 = smov 0   ;;  %s1504_s16 = smov 0   ;;  %s1829_s0 = inlined_call_operand.vmem [shape: f32[128,1152], index: 0, kind: input, shape index: {}]   ;;  %s1830_s1 = inlined_call_operand.vmem [shape: f32[1152,128], index: 1, kind: input, shape index: {}]   ;;  %s1831_s2 = inlined_call_operand.vmem [shape: f32[128,128], index: 2, kind: output, shape index: {0}]   ;;  %s1832_s3 = inlined_call_operand.vmem [shape: f32[8,128], index: 3, kind: output, shape index: {1}]   ;;  %s1833_s4 = inlined_call_operand.vmem [shape: f32[8,128], index: 4, kind: output, shape index: {2}]  }
   0x1   :  { %s1506_s17 = smov 0   ;;  %s1508_s18 = smov 0  }
   0x2   :  { %s1510_s19 = smov 0  }
   0x3 LB: > { %s27_s20 = sadd.s32 1, %s1469_s18  ;;  %p50_p1 = scmp.ne.s32.totalorder %s1461_s16, %s1457_s15  ;;  %s1473_s19 = sphi %s1510_s19, %s15_s19   ;;  %s1469_s18 = sphi %s1508_s18, %s1837_s18   ;;  %s1465_s17 = sphi %s1506_s17, %s1836_s17   ;;  %s1461_s16 = sphi %s1504_s16, %s1835_s16   ;;  %s1457_s15 = sphi %s1502_s15, %s1834_s15  }
   0x4   : > { %p28_p0 = scmp.ge.s32.totalorder %s27_s20, 3  ;;  %p51_p2 = scmp.eq.s32.totalorder %s1473_s19, 0 }
   0x5   : > { %s43_s22 = sadd.s32 1, %s1461_s16  ;;  %p1146_p5 = scmp.ge.s32.totalorder %s1473_s19, 3 }
   0x6   : > { %s1839_s20 = smov (%p28_p0, %s27_s20), 0  ;;  %p52_p3 = por %p51_p2, %p50_p1 }
   0x7   : > { %s39_s21 = ssub.s32 %s1469_s18, %s1839_s20  ;;  %188 = sbr.rel (%p1146_p5) target bundleno = 43 (0x2b), region = 16 }
   0x8   : > { %p41_p4 = scmp.eq.s32.totalorder %s39_s21, 0 }
   0xa   : > { %s1537_s23 = scalar_select %p41_p4, %s1461_s16, %s43_s22  }
   0xe   : > { %191 = sbr.rel (!%p52_p3) target bundleno = 43 (0x2b), region = 20  ;;  %s193_s24 = sand.u32 (%p52_p3), 1, %s1461_s16  }
   0xf   : > { %s1158_s25 = smul.u32 (%p52_p3), 24, %s1469_s18 }
  0x10   : > { %s1391_s26 = smul.u32 (%p52_p3), 384, %s193_s24 }
  0x11   : > { %s1545_s29 = scalar_lea.vmem (%p52_p3), %s1829_s0, %s1158_s25 }
  0x12   : > { %v214_v0 = vld [vmem:[%s1545_s29] sm:$0xff] (%p52_p3)  ;;  %v216_v1 = vld [vmem:[%s1545_s29 + $0x8] sm:$0xff] (%p52_p3)  ;;  %v218_v2 = vld [vmem:[%s1545_s29 + $0x10] sm:$0xff] (%p52_p3)  ;;  %s1550_s30 = scalar_lea.vmem (%p52_p3), [#allocation3], %s1391_s26 }
  0x13   : > { %215 = vst [vmem:[%s1550_s30] sm:$0xff] (%p52_p3), %v214_v0  ;;  %217 = vst [vmem:[%s1550_s30 + $0x8] sm:$0xff] (%p52_p3), %v216_v1  ;;  %v220_v3 = vld [vmem:[%s1545_s29 + $0x48] sm:$0xff] (%p52_p3)  ;;  %v222_v4 = vld [vmem:[%s1545_s29 + $0x50] sm:$0xff] (%p52_p3) }
  0x14   : > { %219 = vst [vmem:[%s1550_s30 + $0x10] sm:$0xff] (%p52_p3), %v218_v2  ;;  %v224_v5 = vld [vmem:[%s1545_s29 + $0x58] sm:$0xff] (%p52_p3)  ;;  %221 = vst [vmem:[%s1550_s30 + $0x18] sm:$0xff] (%p52_p3), %v220_v3  ;;  %v226_v6 = vld [vmem:[%s1545_s29 + $0x90] sm:$0xff] (%p52_p3) }
  0x15   : > { %223 = vst [vmem:[%s1550_s30 + $0x20] sm:$0xff] %v222_v4  ;;  %225 = vst [vmem:[%s1550_s30 + $0x28] sm:$0xff] %v224_v5  ;;  %v228_v7 = vld [vmem:[%s1545_s29 + $0x98] sm:$0xff]  ;;  %v230_v8 = vld [vmem:[%s1545_s29 + $0xa0] sm:$0xff] }
  0x16   : > { %227 = vst [vmem:[%s1550_s30 + $0x30] sm:$0xff] %v226_v6  ;;  %229 = vst [vmem:[%s1550_s30 + $0x38] sm:$0xff] %v228_v7  ;;  %v232_v9 = vld [vmem:[%s1545_s29 + $0xd8] sm:$0xff]  ;;  %v234_v10 = vld [vmem:[%s1545_s29 + $0xe0] sm:$0xff] }
  0x17   : > { %231 = vst [vmem:[%s1550_s30 + $0x40] sm:$0xff] %v230_v8  ;;  %v236_v11 = vld [vmem:[%s1545_s29 + $0xe8] sm:$0xff]  ;;  %233 = vst [vmem:[%s1550_s30 + $0x48] sm:$0xff] %v232_v9  ;;  %v238_v12 = vld [vmem:[%s1545_s29 + $0x120] sm:$0xff] }
  0x18   : > { %235 = vst [vmem:[%s1550_s30 + $0x50] sm:$0xff] %v234_v10  ;;  %237 = vst [vmem:[%s1550_s30 + $0x58] sm:$0xff] %v236_v11  ;;  %v240_v13 = vld [vmem:[%s1545_s29 + $0x128] sm:$0xff]  ;;  %v242_v14 = vld [vmem:[%s1545_s29 + $0x130] sm:$0xff] }
  0x19   : > { %239 = vst [vmem:[%s1550_s30 + $0x60] sm:$0xff] %v238_v12  ;;  %241 = vst [vmem:[%s1550_s30 + $0x68] sm:$0xff] %v240_v13  ;;  %v244_v15 = vld [vmem:[%s1545_s29 + $0x168] sm:$0xff]  ;;  %v246_v16 = vld [vmem:[%s1545_s29 + $0x170] sm:$0xff] }
  0x1a   : > { %243 = vst [vmem:[%s1550_s30 + $0x70] sm:$0xff] %v242_v14  ;;  %v248_v17 = vld [vmem:[%s1545_s29 + $0x178] sm:$0xff]  ;;  %245 = vst [vmem:[%s1550_s30 + $0x78] sm:$0xff] %v244_v15  ;;  %v250_v18 = vld [vmem:[%s1545_s29 + $0x1b0] sm:$0xff] }
  0x1b   : > { %247 = vst [vmem:[%s1550_s30 + $0x80] sm:$0xff] %v246_v16  ;;  %249 = vst [vmem:[%s1550_s30 + $0x88] sm:$0xff] %v248_v17  ;;  %v252_v19 = vld [vmem:[%s1545_s29 + $0x1b8] sm:$0xff]  ;;  %v254_v20 = vld [vmem:[%s1545_s29 + $0x1c0] sm:$0xff] }
  0x1c   : > { %251 = vst [vmem:[%s1550_s30 + $0x90] sm:$0xff] %v250_v18  ;;  %253 = vst [vmem:[%s1550_s30 + $0x98] sm:$0xff] %v252_v19  ;;  %v256_v21 = vld [vmem:[%s1545_s29 + $0x1f8] sm:$0xff]  ;;  %v258_v22 = vld [vmem:[%s1545_s29 + $0x200] sm:$0xff] }
  0x1d   : > { %255 = vst [vmem:[%s1550_s30 + $0xa0] sm:$0xff] %v254_v20  ;;  %v260_v23 = vld [vmem:[%s1545_s29 + $0x208] sm:$0xff]  ;;  %257 = vst [vmem:[%s1550_s30 + $0xa8] sm:$0xff] %v256_v21  ;;  %v262_v24 = vld [vmem:[%s1545_s29 + $0x240] sm:$0xff] }
  0x1e   : > { %259 = vst [vmem:[%s1550_s30 + $0xb0] sm:$0xff] %v258_v22  ;;  %261 = vst [vmem:[%s1550_s30 + $0xb8] sm:$0xff] %v260_v23  ;;  %v264_v25 = vld [vmem:[%s1545_s29 + $0x248] sm:$0xff]  ;;  %v266_v26 = vld [vmem:[%s1545_s29 + $0x250] sm:$0xff] }
  0x1f   : > { %263 = vst [vmem:[%s1550_s30 + $0xc0] sm:$0xff] %v262_v24  ;;  %265 = vst [vmem:[%s1550_s30 + $0xc8] sm:$0xff] %v264_v25  ;;  %v268_v27 = vld [vmem:[%s1545_s29 + $0x288] sm:$0xff]  ;;  %v270_v28 = vld [vmem:[%s1545_s29 + $0x290] sm:$0xff] }
  0x20   : > { %267 = vst [vmem:[%s1550_s30 + $0xd0] sm:$0xff] %v266_v26  ;;  %v272_v29 = vld [vmem:[%s1545_s29 + $0x298] sm:$0xff]  ;;  %269 = vst [vmem:[%s1550_s30 + $0xd8] sm:$0xff] %v268_v27  ;;  %v274_v30 = vld [vmem:[%s1545_s29 + $0x2d0] sm:$0xff] }
  0x21   : > { %271 = vst [vmem:[%s1550_s30 + $0xe0] sm:$0xff] %v270_v28  ;;  %273 = vst [vmem:[%s1550_s30 + $0xe8] sm:$0xff] %v272_v29  ;;  %v276_v31 = vld [vmem:[%s1545_s29 + $0x2d8] sm:$0xff]  ;;  %v278_v32 = vld [vmem:[%s1545_s29 + $0x2e0] sm:$0xff] }
  0x22   : > { %275 = vst [vmem:[%s1550_s30 + $0xf0] sm:$0xff] %v274_v30  ;;  %277 = vst [vmem:[%s1550_s30 + $0xf8] sm:$0xff] %v276_v31  ;;  %v280_v33 = vld [vmem:[%s1545_s29 + $0x318] sm:$0xff]  ;;  %v282_v34 = vld [vmem:[%s1545_s29 + $0x320] sm:$0xff] }
  0x23   : > { %279 = vst [vmem:[%s1550_s30 + $0x100] sm:$0xff] %v278_v32  ;;  %v284_v35 = vld [vmem:[%s1545_s29 + $0x328] sm:$0xff]  ;;  %281 = vst [vmem:[%s1550_s30 + $0x108] sm:$0xff] %v280_v33  ;;  %v286_v36 = vld [vmem:[%s1545_s29 + $0x360] sm:$0xff] }
  0x24   : > { %283 = vst [vmem:[%s1550_s30 + $0x110] sm:$0xff] %v282_v34  ;;  %285 = vst [vmem:[%s1550_s30 + $0x118] sm:$0xff] %v284_v35  ;;  %v288_v37 = vld [vmem:[%s1545_s29 + $0x368] sm:$0xff]  ;;  %v290_v38 = vld [vmem:[%s1545_s29 + $0x370] sm:$0xff] }
  0x25   : > { %287 = vst [vmem:[%s1550_s30 + $0x120] sm:$0xff] %v286_v36  ;;  %289 = vst [vmem:[%s1550_s30 + $0x128] sm:$0xff] %v288_v37  ;;  %v292_v39 = vld [vmem:[%s1545_s29 + $0x3a8] sm:$0xff]  ;;  %v294_v40 = vld [vmem:[%s1545_s29 + $0x3b0] sm:$0xff] }
  0x26   : > { %291 = vst [vmem:[%s1550_s30 + $0x130] sm:$0xff] %v290_v38  ;;  %v296_v41 = vld [vmem:[%s1545_s29 + $0x3b8] sm:$0xff]  ;;  %293 = vst [vmem:[%s1550_s30 + $0x138] sm:$0xff] %v292_v39  ;;  %v298_v42 = vld [vmem:[%s1545_s29 + $0x3f0] sm:$0xff] }
  0x27   : > { %295 = vst [vmem:[%s1550_s30 + $0x140] sm:$0xff] %v294_v40  ;;  %297 = vst [vmem:[%s1550_s30 + $0x148] sm:$0xff] %v296_v41  ;;  %v300_v43 = vld [vmem:[%s1545_s29 + $0x3f8] sm:$0xff]  ;;  %v302_v44 = vld [vmem:[%s1545_s29 + $0x400] sm:$0xff] }
  0x28   : > { %299 = vst [vmem:[%s1550_s30 + $0x150] sm:$0xff] %v298_v42  ;;  %301 = vst [vmem:[%s1550_s30 + $0x158] sm:$0xff] %v300_v43  ;;  %v304_v45 = vld [vmem:[%s1545_s29 + $0x438] sm:$0xff]  ;;  %v306_v46 = vld [vmem:[%s1545_s29 + $0x440] sm:$0xff] }
  0x29   : > { %303 = vst [vmem:[%s1550_s30 + $0x160] sm:$0xff] %v302_v44  ;;  %v308_v47 = vld [vmem:[%s1545_s29 + $0x448] sm:$0xff]  ;;  %305 = vst [vmem:[%s1550_s30 + $0x168] sm:$0xff] %v304_v45 }
  0x2a   : > { %307 = vst [vmem:[%s1550_s30 + $0x170] sm:$0xff] %v306_v46  ;;  %309 = vst [vmem:[%s1550_s30 + $0x178] sm:$0xff] %v308_v47 }
  0x2b PF: > { %p1148_p6 = scmp.ge.s32.totalorder %s1473_s19, 1  ;;  %p326_p7 = scmp.lt.s32.totalorder %s1473_s19, 4 }
  0x2d   : > { %p327_p8 = pnand %p1148_p6, %p326_p7 }
  0x2e   : > { %s333_s5 = sand.u32 (!%p327_p8), 1, %s1457_s15   ;;  %s385_s6 = smul.u32 (!%p327_p8), 48, %s1465_s17 }
  0x2f   : > { %330 = sbr.rel (%p327_p8) target bundleno = 414 (0x19e), region = 47  ;;  %p1150_p10 = scmp.ne.s32.totalorder (!%p327_p8), %s1465_s17, 0 }
  0x30   : > { %s1392_s7 = smul.u32 (!%p327_p8), 384, %s333_s5  ;;  %p386_p9 = scmp.lt.s32.totalorder (!%p327_p8), %s385_s6, 143 }
  0x32   : > { %s1654_s12 = scalar_lea.vmem (!%p327_p8), [#allocation3], %s1392_s7 }
  0x36   : > { %s1841_s6 = smov (!%p386_p9, %s385_s6), 143  ;;  %420 = sbr.rel (%p1150_p10) target bundleno = 64 (0x40), region = 55 }
  0x37   : > { %s1149_s8 = sshll.u32 %s1841_s6, 3  ;;  %v1475_v48 = vmov (!%p1150_p10), 0.0  }
  0x38   : > { %s1652_s11 = scalar_lea.vmem %s1830_s1, %s1149_s8  ;;  %421 = vst [vmem:[#allocation2] sm:$0xff] (!%p1150_p10), %v1475_v48  ;;  %422 = vst [vmem:[#allocation2 + $0x8] sm:$0xff] (!%p1150_p10), %v1475_v48 }
  0x39   : > { %423 = vst [vmem:[#allocation2 + $0x10] sm:$0xff] (!%p1150_p10), %v1475_v48  ;;  %424 = vst [vmem:[#allocation2 + $0x18] sm:$0xff] (!%p1150_p10), %v1475_v48 }
  0x3a   : > { %425 = vst [vmem:[#allocation2 + $0x20] sm:$0xff] (!%p1150_p10), %v1475_v48  ;;  %426 = vst [vmem:[#allocation2 + $0x28] sm:$0xff] (!%p1150_p10), %v1475_v48 }
  0x3b   : > { %427 = vst [vmem:[#allocation2 + $0x30] sm:$0xff] (!%p1150_p10), %v1475_v48  ;;  %428 = vst [vmem:[#allocation2 + $0x38] sm:$0xff] (!%p1150_p10), %v1475_v48 }
  0x3c   : > { %429 = vst [vmem:[#allocation2 + $0x40] sm:$0xff] (!%p1150_p10), %v1475_v48  ;;  %430 = vst [vmem:[#allocation2 + $0x48] sm:$0xff] (!%p1150_p10), %v1475_v48 }
  0x3d   : > { %431 = vst [vmem:[#allocation2 + $0x50] sm:$0xff] %v1475_v48  ;;  %432 = vst [vmem:[#allocation2 + $0x58] sm:$0xff] %v1475_v48 }
  0x3e   : > { %433 = vst [vmem:[#allocation2 + $0x60] sm:$0xff] %v1475_v48  ;;  %434 = vst [vmem:[#allocation2 + $0x68] sm:$0xff] %v1475_v48 }
  0x3f   : > { %435 = vst [vmem:[#allocation2 + $0x70] sm:$0xff] %v1475_v48  ;;  %436 = vst [vmem:[#allocation2 + $0x78] sm:$0xff] %v1475_v48 }
  0x40 PF: > { %v517_v49 = vld [vmem:[%s1652_s11 + $0x80] sm:$0xff]  ;;  %v518_v50 = vld [vmem:[%s1652_s11 + $0x88] sm:$0xff]  ;;  %v519_v58 = vld [vmem:[%s1652_s11 + $0x90] sm:$0xff]  ;;  %p1151_p11 = scmp.ne.s32.totalorder %s1465_s17, 2 }
  0x41   : > { %v501_v51 = vld [vmem:[%s1652_s11] sm:$0xff]  ;;  %v1327_v52 = vpack.c.bf16 %v518_v50, %v517_v49  ;;  %v502_v53 = vld [vmem:[%s1652_s11 + $0x8] sm:$0xff]  ;;  %v520_v59 = vld [vmem:[%s1652_s11 + $0x98] sm:$0xff] }
  0x42   : > { %v533_v54 = vld [vmem:[%s1652_s11 + $0x100] sm:$0xff]  ;;  %v534_v55 = vld [vmem:[%s1652_s11 + $0x108] sm:$0xff]  ;;  %v1329_v56 = vpack.c.bf16 %v502_v53, %v501_v51  ;;  %v503_v60 = vld [vmem:[%s1652_s11 + $0x10] sm:$0xff]  ;;  %v1331_v61 = vpack.c.bf16 %v520_v59, %v519_v58 }
  0x43   : > { %v1359_v57 = vpack.c.bf16 %v534_v55, %v533_v54  ;;  %1328 = vmatprep.subr.bf16.mxu0 %v1327_v52  ;;  %v504_v62 = vld [vmem:[%s1652_s11 + $0x18] sm:$0xff]  ;;  %v535_v63 = vld [vmem:[%s1652_s11 + $0x110] sm:$0xff]  ;;  %v521_v3 = vld [vmem:[%s1652_s11 + $0xa0] sm:$0xff] }
  0x44   : > { %v536_v0 = vld [vmem:[%s1652_s11 + $0x118] sm:$0xff]  ;;  %1330 = vmatpush3.bf16.msra.mxu0 %v1329_v56  ;;  %v1333_v1 = vpack.c.bf16 %v504_v62, %v503_v60  ;;  %v522_v4 = vld [vmem:[%s1652_s11 + $0xa8] sm:$0xff]  ;;  %v505_v5 = vld [vmem:[%s1652_s11 + $0x20] sm:$0xff] }
  0x45   : > { %1360 = vmatprep.subr.bf16.mxu1 %v1359_v57  ;;  %v1363_v2 = vpack.c.bf16 %v536_v0, %v535_v63  ;;  %1332 = vmatprep.subr.bf16.mxu0 %v1331_v61  ;;  %v1335_v6 = vpack.c.bf16 %v522_v4, %v521_v3  ;;  %v506_v7 = vld [vmem:[%s1652_s11 + $0x28] sm:$0xff]  ;;  %v537_v8 = vld [vmem:[%s1652_s11 + $0x120] sm:$0xff]  ;;  %v523_v11 = vld [vmem:[%s1652_s11 + $0xb0] sm:$0xff] }
  0x46   : > { %1362 = vmatpush3.bf16.msra.mxu1 %v1359_v57  ;;  %v538_v9 = vld [vmem:[%s1652_s11 + $0x128] sm:$0xff]  ;;  %v524_v12 = vld [vmem:[%s1652_s11 + $0xb8] sm:$0xff]  ;;  %v539_v13 = vld [vmem:[%s1652_s11 + $0x130] sm:$0xff]  ;;  %v1337_v15 = vpack.c.bf16 %v506_v7, %v505_v5 }
  0x47   : > { %1364 = vmatprep.subr.bf16.mxu1 %v1363_v2  ;;  %v1367_v10 = vpack.c.bf16 %v538_v9, %v537_v8  ;;  %v540_v14 = vld [vmem:[%s1652_s11 + $0x138] sm:$0xff]  ;;  %v1339_v16 = vpack.c.bf16 %v524_v12, %v523_v11  ;;  %v507_v17 = vld [vmem:[%s1652_s11 + $0x30] sm:$0xff]  ;;  %v525_v20 = vld [vmem:[%s1652_s11 + $0xc0] sm:$0xff] }
  0x48   : > { %1334 = vmatpush3.bf16.msra.mxu0 %v1333_v1  ;;  %v508_v18 = vld [vmem:[%s1652_s11 + $0x38] sm:$0xff]  ;;  %v1371_v19 = vpack.c.bf16 %v540_v14, %v539_v13  ;;  %v526_v21 = vld [vmem:[%s1652_s11 + $0xc8] sm:$0xff]  ;;  %v541_v22 = vld [vmem:[%s1652_s11 + $0x140] sm:$0xff] }
  0x49   : > { %1336 = vmatprep.subr.bf16.mxu0 %v1335_v6  ;;  %v542_v23 = vld [vmem:[%s1652_s11 + $0x148] sm:$0xff]  ;;  %v1341_v24 = vpack.c.bf16 %v508_v18, %v507_v17  ;;  %v1343_v25 = vpack.c.bf16 %v526_v21, %v525_v20  ;;  %v509_v26 = vld [vmem:[%s1652_s11 + $0x40] sm:$0xff]  ;;  %v527_v29 = vld [vmem:[%s1652_s11 + $0xd0] sm:$0xff] }
  0x4a   : > { %1366 = vmatpush3.bf16.msra.mxu1 %v1363_v2  ;;  %v510_v27 = vld [vmem:[%s1652_s11 + $0x48] sm:$0xff]  ;;  %v1375_v28 = vpack.c.bf16 %v542_v23, %v541_v22  ;;  %v528_v30 = vld [vmem:[%s1652_s11 + $0xd8] sm:$0xff]  ;;  %v543_v31 = vld [vmem:[%s1652_s11 + $0x150] sm:$0xff] }
  0x4b   : > { %1368 = vmatprep.subr.bf16.mxu1 %v1367_v10  ;;  %v544_v32 = vld [vmem:[%s1652_s11 + $0x158] sm:$0xff]  ;;  %v1345_v33 = vpack.c.bf16 %v510_v27, %v509_v26  ;;  %v454_v34 = vld [vmem:[%s1654_s12 + $0x8] sm:$0xff]  ;;  %v455_v35 = vld [vmem:[%s1654_s12 + $0x10] sm:$0xff]  ;;  %v1347_v36 = vpack.c.bf16 %v528_v30, %v527_v29 }
  0x4c   : > { %1338 = vmatpush3.bf16.msra.mxu0 %v1337_v15  ;;  %v511_v37 = vld [vmem:[%s1652_s11 + $0x50] sm:$0xff]  ;;  %v512_v38 = vld [vmem:[%s1652_s11 + $0x58] sm:$0xff]  ;;  %v1379_v39 = vpack.c.bf16 %v544_v32, %v543_v31  ;;  %v529_v40 = vld [vmem:[%s1652_s11 + $0xe0] sm:$0xff]  ;;  %613 = vmatprep.mubr.f32.mxu0 %v454_v34 }
  0x4d   : > { %1340 = vmatprep.subr.bf16.mxu0 %v1339_v16  ;;  %v530_v41 = vld [vmem:[%s1652_s11 + $0xe8] sm:$0xff]  ;;  %v545_v42 = vld [vmem:[%s1652_s11 + $0x160] sm:$0xff]  ;;  %1303 = vmatprep.mubr.f32.mxu1 %v455_v35  ;;  %v1349_v44 = vpack.c.bf16 %v512_v38, %v511_v37  ;;  %v531_v49 = vld [vmem:[%s1652_s11 + $0xf0] sm:$0xff] }
  0x4e   : > { %1370 = vmatpush3.bf16.msra.mxu1 %v1367_v10  ;;  %v546_v43 = vld [vmem:[%s1652_s11 + $0x168] sm:$0xff]  ;;  %v1351_v45 = vpack.c.bf16 %v530_v41, %v529_v40  ;;  %v513_v46 = vld [vmem:[%s1652_s11 + $0x60] sm:$0xff]  ;;  %v532_v50 = vld [vmem:[%s1652_s11 + $0xf8] sm:$0xff] }
  0x4f   : > { %1372 = vmatprep.subr.bf16.mxu1 %v1371_v19  ;;  %v514_v47 = vld [vmem:[%s1652_s11 + $0x68] sm:$0xff]  ;;  %v1383_v48 = vpack.c.bf16 %v546_v43, %v545_v42  ;;  %v547_v51 = vld [vmem:[%s1652_s11 + $0x170] sm:$0xff]  ;;  %v548_v52 = vld [vmem:[%s1652_s11 + $0x178] sm:$0xff]  ;;  %v1355_v54 = vpack.c.bf16 %v532_v50, %v531_v49 }
  0x50   : > { %1342 = vmatpush3.bf16.msra.mxu0 %v1341_v24  ;;  %v1353_v53 = vpack.c.bf16 %v514_v47, %v513_v46  ;;  %v515_v55 = vld [vmem:[%s1652_s11 + $0x70] sm:$0xff]  ;;  %v516_v56 = vld [vmem:[%s1652_s11 + $0x78] sm:$0xff]  ;;  %v1387_v57 = vpack.c.bf16 %v548_v52, %v547_v51  ;;  %v453_v59 = vld [vmem:[%s1654_s12] sm:$0xff] }
  0x51   : > { %1344 = vmatprep.subr.bf16.mxu0 %v1343_v25  ;;  %v1357_v58 = vpack.c.bf16 %v516_v56, %v515_v55  ;;  %v458_v60 = vld [vmem:[%s1654_s12 + $0x28] sm:$0xff]  ;;  %v457_v61 = vld [vmem:[%s1654_s12 + $0x20] sm:$0xff]  ;;  %v456_v63 = vld [vmem:[%s1654_s12 + $0x18] sm:$0xff] }
  0x52   : > { %1374 = vmatpush3.bf16.msra.mxu1 %v1371_v19  ;;  %v461_v62 = vld [vmem:[%s1654_s12 + $0x40] sm:$0xff]  ;;  %v460_v0 = vld [vmem:[%s1654_s12 + $0x38] sm:$0xff]  ;;  %v467_v2 = vld [vmem:[%s1654_s12 + $0x70] sm:$0xff] }
  0x53   : > { %1376 = vmatprep.subr.bf16.mxu1 %v1375_v28  ;;  %v464_v1 = vld [vmem:[%s1654_s12 + $0x58] sm:$0xff]  ;;  %v459_v3 = vld [vmem:[%s1654_s12 + $0x30] sm:$0xff]  ;;  %v470_v5 = vld [vmem:[%s1654_s12 + $0x88] sm:$0xff] }
  0x54   : > { %1346 = vmatpush3.bf16.msra.mxu0 %v1345_v33  ;;  %v463_v4 = vld [vmem:[%s1654_s12 + $0x50] sm:$0xff]  ;;  %v473_v6 = vld [vmem:[%s1654_s12 + $0xa0] sm:$0xff]  ;;  %v462_v7 = vld [vmem:[%s1654_s12 + $0x48] sm:$0xff] }
  0x55   : > { %1348 = vmatprep.subr.bf16.mxu0 %v1347_v36  ;;  %v466_v8 = vld [vmem:[%s1654_s12 + $0x68] sm:$0xff]  ;;  %v476_v9 = vld [vmem:[%s1654_s12 + $0xb8] sm:$0xff]  ;;  %v479_v10 = vld [vmem:[%s1654_s12 + $0xd0] sm:$0xff] }
  0x56   : > { %1378 = vmatpush3.bf16.msra.mxu1 %v1375_v28  ;;  %v465_v11 = vld [vmem:[%s1654_s12 + $0x60] sm:$0xff]  ;;  %v482_v13 = vld [vmem:[%s1654_s12 + $0xe8] sm:$0xff]  ;;  %v468_v15 = vld [vmem:[%s1654_s12 + $0x78] sm:$0xff] }
  0x57   : > { %1380 = vmatprep.subr.bf16.mxu1 %v1379_v39  ;;  %v469_v12 = vld [vmem:[%s1654_s12 + $0x80] sm:$0xff]  ;;  %v472_v16 = vld [vmem:[%s1654_s12 + $0x98] sm:$0xff]  ;;  %v491_v18 = vld [vmem:[%s1654_s12 + $0x130] sm:$0xff] }
  0x58   : > { %1350 = vmatpush3.bf16.msra.mxu0 %v1349_v44  ;;  %v485_v14 = vld [vmem:[%s1654_s12 + $0x100] sm:$0xff]  ;;  %v488_v17 = vld [vmem:[%s1654_s12 + $0x118] sm:$0xff]  ;;  %v471_v19 = vld [vmem:[%s1654_s12 + $0x90] sm:$0xff] }
  0x59   : > { %1352 = vmatprep.subr.bf16.mxu0 %v1351_v45  ;;  %v475_v20 = vld [vmem:[%s1654_s12 + $0xb0] sm:$0xff]  ;;  %v494_v21 = vld [vmem:[%s1654_s12 + $0x148] sm:$0xff]  ;;  %v497_v22 = vld [vmem:[%s1654_s12 + $0x160] sm:$0xff] }
  0x5a   : > { %1382 = vmatpush3.bf16.msra.mxu1 %v1379_v39  ;;  %v474_v23 = vld [vmem:[%s1654_s12 + $0xa8] sm:$0xff]  ;;  %v500_v25 = vld [vmem:[%s1654_s12 + $0x178] sm:$0xff]  ;;  %v477_v26 = vld [vmem:[%s1654_s12 + $0xc0] sm:$0xff] }
  0x5b   : > { %1384 = vmatprep.subr.bf16.mxu1 %v1383_v48  ;;  %v478_v24 = vld [vmem:[%s1654_s12 + $0xc8] sm:$0xff]  ;;  %v481_v27 = vld [vmem:[%s1654_s12 + $0xe0] sm:$0xff]  ;;  %v480_v28 = vld [vmem:[%s1654_s12 + $0xd8] sm:$0xff] }
  0x5c   : > { %1354 = vmatpush3.bf16.msra.mxu0 %v1353_v53  ;;  %v484_v29 = vld [vmem:[%s1654_s12 + $0xf8] sm:$0xff]  ;;  %v483_v30 = vld [vmem:[%s1654_s12 + $0xf0] sm:$0xff]  ;;  %v486_v32 = vld [vmem:[%s1654_s12 + $0x108] sm:$0xff] }
  0x5d   : > { %1356 = vmatprep.subr.bf16.mxu0 %v1355_v54  ;;  %v487_v31 = vld [vmem:[%s1654_s12 + $0x110] sm:$0xff]  ;;  %v490_v33 = vld [vmem:[%s1654_s12 + $0x128] sm:$0xff]  ;;  %v489_v34 = vld [vmem:[%s1654_s12 + $0x120] sm:$0xff] }
  0x5e   : > { %1386 = vmatpush3.bf16.msra.mxu1 %v1383_v48  ;;  %v493_v35 = vld [vmem:[%s1654_s12 + $0x140] sm:$0xff]  ;;  %v492_v36 = vld [vmem:[%s1654_s12 + $0x138] sm:$0xff]  ;;  %v495_v38 = vld [vmem:[%s1654_s12 + $0x150] sm:$0xff] }
  0x5f   : > { %1388 = vmatprep.subr.bf16.mxu1 %v1387_v57  ;;  %v496_v37 = vld [vmem:[%s1654_s12 + $0x158] sm:$0xff]  ;;  %v499_v39 = vld [vmem:[%s1654_s12 + $0x170] sm:$0xff]  ;;  %v498_v40 = vld [vmem:[%s1654_s12 + $0x168] sm:$0xff] }
  0x60   : > { %1358 = vmatpush3.bf16.msra.mxu0 %v1357_v58  ;;  %v437_v46 = vld [vmem:[#allocation2] sm:$0xff]  ;;  %v438_v54 = vld [vmem:[#allocation2 + $0x8] sm:$0xff] }
  0x62   : > { %1390 = vmatpush3.bf16.msra.mxu1 %v1387_v57 }
  0x63   : > { %614 = vmatmul.mubr.f32.vlgmr.msra.gmra.mrb[0].mxu0 %v453_v59 }
  0x64   : > { %618 = vmatprep.mubr.f32.mxu0 %v457_v61 }
  0x65   : > { %1304 = vmatmul.mubr.f32.vlgmr.msra.gmra.mrb[0].mxu1 %v458_v60 }
  0x66   : > { %1306 = vmatprep.mubr.f32.mxu1 %v461_v62  ;;  %v439_v62 = vld [vmem:[#allocation2 + $0x10] sm:$0xff] }
  0x67   : > { %619 = vmatmul.mubr.f32.gmra.mrb[2].mxu0 %v456_v63 }
  0x68   : > { %623 = vmatprep.mubr.f32.mxu0 %v460_v0 }
  0x69   : > { %1307 = vmatmul.mubr.f32.gmra.mrb[2].mxu1 %v464_v1 }
  0x6a   : > { %1309 = vmatprep.mubr.f32.mxu1 %v467_v2 }
  0x6b   : > { %624 = vmatmul.mubr.f32.gmra.mrb[4].mxu0 %v459_v3 }
  0x6c   : > { %628 = vmatprep.mubr.f32.mxu0 %v463_v4 }
  0x6d   : > { %1310 = vmatmul.mubr.f32.gmra.mrb[4].mxu1 %v470_v5 }
  0x6e   : > { %1312 = vmatprep.mubr.f32.mxu1 %v473_v6  ;;  %v440_v6 = vld [vmem:[#allocation2 + $0x18] sm:$0xff] }
  0x6f   : > { %629 = vmatmul.mubr.f32.gmra.mrb[6].mxu0 %v462_v7 }
  0x70   : > { %633 = vmatprep.mubr.f32.mxu0 %v466_v8 }
  0x71   : > { %1313 = vmatmul.mubr.f32.gmra.mrb[6].mxu1 %v476_v9 }
  0x72   : > { %1315 = vmatprep.mubr.f32.mxu1 %v479_v10 }
  0x73   : > { %634 = vmatmul.mubr.f32.gmra.mrb[8].mxu0 %v465_v11 }
  0x74   : > { %638 = vmatprep.mubr.f32.mxu0 %v469_v12 }
  0x75   : > { %1316 = vmatmul.mubr.f32.gmra.mrb[8].mxu1 %v482_v13 }
  0x76   : > { %1318 = vmatprep.mubr.f32.mxu1 %v485_v14  ;;  %v441_v14 = vld [vmem:[#allocation2 + $0x20] sm:$0xff] }
  0x77   : > { %639 = vmatmul.mubr.f32.gmra.mrb[10].mxu0 %v468_v15 }
  0x78   : > { %643 = vmatprep.mubr.f32.mxu0 %v472_v16 }
  0x79   : > { %1319 = vmatmul.mubr.f32.gmra.mrb[10].mxu1 %v488_v17 }
  0x7a   : > { %1321 = vmatprep.mubr.f32.mxu1 %v491_v18 }
  0x7b   : > { %644 = vmatmul.mubr.f32.gmra.mrb[12].mxu0 %v471_v19 }
  0x7c   : > { %648 = vmatprep.mubr.f32.mxu0 %v475_v20 }
  0x7d   : > { %1322 = vmatmul.mubr.f32.gmra.mrb[12].mxu1 %v494_v21 }
  0x7e   : > { %1324 = vmatprep.mubr.f32.mxu1 %v497_v22  ;;  %v442_v22 = vld [vmem:[#allocation2 + $0x28] sm:$0xff] }
  0x7f   : > { %649 = vmatmul.mubr.f32.gmra.mrb[14].mxu0 %v474_v23 }
  0x80   : > { %653 = vmatprep.mubr.f32.mxu0 %v478_v24 }
  0x81   : > { %1325 = vmatmul.mubr.f32.gmra.mrb[14].mxu1 %v500_v25 }
  0x83   : > { %654 = vmatmul.mubr.f32.gmra.mrb[16].mxu0 %v477_v26 }
  0x84   : > { %658 = vmatprep.mubr.f32.mxu0 %v481_v27 }
  0x87   : > { %659 = vmatmul.mubr.f32.gmra.mrb[18].mxu0 %v480_v28 }
  0x88   : > { %663 = vmatprep.mubr.f32.mxu0 %v484_v29 }
  0x8b   : > { %664 = vmatmul.mubr.f32.gmra.mrb[20].mxu0 %v483_v30  ;;  %v443_v30 = vld [vmem:[#allocation2 + $0x30] sm:$0xff] }
  0x8c   : > { %668 = vmatprep.mubr.f32.mxu0 %v487_v31 }
  0x8f   : > { %669 = vmatmul.mubr.f32.gmra.mrb[22].mxu0 %v486_v32 }
  0x90   : > { %673 = vmatprep.mubr.f32.mxu0 %v490_v33 }
  0x93   : > { %674 = vmatmul.mubr.f32.gmra.mrb[24].mxu0 %v489_v34 }
  0x94   : > { %678 = vmatprep.mubr.f32.mxu0 %v493_v35 }
  0x97   : > { %679 = vmatmul.mubr.f32.gmra.mrb[26].mxu0 %v492_v36 }
  0x98   : > { %683 = vmatprep.mubr.f32.mxu0 %v496_v37 }
  0x9b   : > { %684 = vmatmul.mubr.f32.gmra.mrb[28].mxu0 %v495_v38  ;;  %v444_v38 = vld [vmem:[#allocation2 + $0x38] sm:$0xff] }
  0x9c   : > { %688 = vmatprep.mubr.f32.mxu0 %v499_v39 }
  0x9f   : > { %689 = vmatmul.mubr.f32.gmra.mrb[30].mxu0 %v498_v40 }
 0x136   : > { %v1191_v41 = vpop.f32.mrb[0].mxu0 }
 0x137   : > { %v1192_v42 = vpop.f32.mrb[1].mxu0 }
 0x138   : > { %v1305_v43 = vpop.f32.mrb[0].mxu1  ;;  %v1193_v44 = vadd.f32 %v1192_v42, %v1191_v41 }
 0x139   : > { %v760_v45 = vpop.f32.mrb[1].mxu1 }
 0x13a   : > { %v761_v47 = vadd.f32 %v1193_v44, %v760_v45  ;;  %v1194_v48 = vpop.f32.mrb[2].mxu0  ;;  %v445_v44 = vld [vmem:[#allocation2 + $0x40] sm:$0xff] }
 0x13b   : > { %v1195_v49 = vpop.f32.mrb[3].mxu0 }
 0x13c   : > { %v1308_v50 = vpop.f32.mrb[2].mxu1  ;;  %v839_v51 = vadd.f32 %v761_v47, %v437_v46  ;;  %v1196_v52 = vadd.f32 %v1195_v49, %v1194_v48 }
 0x13d   : > { %v770_v53 = vpop.f32.mrb[3].mxu1 }
 0x13e   : > { %855 = vst [vmem:[#allocation2] sm:$0xff] %v839_v51  ;;  %v766_v55 = vadd.f32 %v1305_v43, %v1196_v52  ;;  %v1197_v56 = vpop.f32.mrb[4].mxu0 }
 0x13f   : > { %v1198_v57 = vpop.f32.mrb[5].mxu0 }
 0x140   : > { %v1311_v58 = vpop.f32.mrb[4].mxu1  ;;  %v840_v59 = vadd.f32 %v766_v55, %v438_v54  ;;  %v1199_v60 = vadd.f32 %v1198_v57, %v1197_v56  ;;  %v447_v56 = vld [vmem:[#allocation2 + $0x50] sm:$0xff] }
 0x141   : > { %v780_v61 = vpop.f32.mrb[5].mxu1 }
 0x142   : > { %856 = vst [vmem:[#allocation2 + $0x8] sm:$0xff] %v840_v59  ;;  %v771_v63 = vadd.f32 %v1199_v60, %v770_v53  ;;  %v1200_v0 = vpop.f32.mrb[6].mxu0 }
 0x143   : > { %v1201_v1 = vpop.f32.mrb[7].mxu0 }
 0x144   : > { %v1314_v2 = vpop.f32.mrb[6].mxu1  ;;  %v841_v3 = vadd.f32 %v771_v63, %v439_v62  ;;  %v1202_v4 = vadd.f32 %v1201_v1, %v1200_v0  ;;  %v448_v62 = vld [vmem:[#allocation2 + $0x58] sm:$0xff] }
 0x145   : > { %v790_v5 = vpop.f32.mrb[7].mxu1 }
 0x146   : > { %857 = vst [vmem:[#allocation2 + $0x10] sm:$0xff] %v841_v3  ;;  %v776_v7 = vadd.f32 %v1308_v50, %v1202_v4  ;;  %v1203_v8 = vpop.f32.mrb[8].mxu0  ;;  %v446_v50 = vld [vmem:[#allocation2 + $0x48] sm:$0xff]  ;;  %v449_v4 = vld [vmem:[#allocation2 + $0x60] sm:$0xff] }
 0x147   : > { %v1204_v9 = vpop.f32.mrb[9].mxu0 }
 0x148   : > { %v1317_v10 = vpop.f32.mrb[8].mxu1  ;;  %v842_v11 = vadd.f32 %v776_v7, %v440_v6  ;;  %v1205_v12 = vadd.f32 %v1204_v9, %v1203_v8 }
 0x149   : > { %v800_v13 = vpop.f32.mrb[9].mxu1 }
 0x14a   : > { %858 = vst [vmem:[#allocation2 + $0x18] sm:$0xff] %v842_v11  ;;  %v781_v15 = vadd.f32 %v1205_v12, %v780_v61  ;;  %v1206_v16 = vpop.f32.mrb[10].mxu0 }
 0x14b   : > { %v1207_v17 = vpop.f32.mrb[11].mxu0 }
 0x14c   : > { %v1320_v18 = vpop.f32.mrb[10].mxu1  ;;  %v843_v19 = vadd.f32 %v781_v15, %v441_v14  ;;  %v1208_v20 = vadd.f32 %v1207_v17, %v1206_v16  ;;  %v451_v16 = vld [vmem:[#allocation2 + $0x70] sm:$0xff] }
 0x14d   : > { %v810_v21 = vpop.f32.mrb[11].mxu1 }
 0x14e   : > { %859 = vst [vmem:[#allocation2 + $0x20] sm:$0xff] %v843_v19  ;;  %v786_v23 = vadd.f32 %v1311_v58, %v1208_v20  ;;  %v1209_v24 = vpop.f32.mrb[12].mxu0 }
 0x14f   : > { %v1210_v25 = vpop.f32.mrb[13].mxu0 }
 0x150   : > { %v1323_v26 = vpop.f32.mrb[12].mxu1  ;;  %v844_v27 = vadd.f32 %v786_v23, %v442_v22  ;;  %v1211_v28 = vadd.f32 %v1210_v25, %v1209_v24  ;;  %v452_v22 = vld [vmem:[#allocation2 + $0x78] sm:$0xff]  ;;  %v875_v25 = vld [vmem:[#allocation2] sm:$0xff] (!%p1151_p11) }
 0x151   : > { %v820_v29 = vpop.f32.mrb[13].mxu1  ;;  %891 = vst [vmem:[%s1831_s2] sm:$0xff] (!%p1151_p11), %v875_v25 }
 0x152   : > { %860 = vst [vmem:[#allocation2 + $0x28] sm:$0xff] %v844_v27  ;;  %v791_v31 = vadd.f32 %v1211_v28, %v790_v5  ;;  %v1212_v32 = vpop.f32.mrb[14].mxu0  ;;  %v877_v27 = vld [vmem:[#allocation2 + $0x10] sm:$0xff] (!%p1151_p11)  ;;  %v1476_v28 = vmov (!%p1151_p11), 0.0  }
 0x153   : > { %v1213_v33 = vpop.f32.mrb[15].mxu0  ;;  %907 = vst [vmem:[%s1832_s3] sm:$0xff] (!%p1151_p11), %v1476_v28  ;;  %908 = vst [vmem:[%s1833_s4] sm:$0xff] (!%p1151_p11), %v1476_v28 }
 0x154   : > { %v1326_v34 = vpop.f32.mrb[14].mxu1  ;;  %v845_v35 = vadd.f32 %v791_v31, %v443_v30  ;;  %v1214_v36 = vadd.f32 %v1213_v33, %v1212_v32  ;;  %893 = vst [vmem:[%s1831_s2 + $0x10] sm:$0xff] (!%p1151_p11), %v877_v27  ;;  %v933_v32 = vmul.f32 (!%p1151_p11), %v877_v27, %v877_v27  ;;  %v878_v33 = vld [vmem:[#allocation2 + $0x18] sm:$0xff] (!%p1151_p11) }
 0x155   : > { %v830_v37 = vpop.f32.mrb[15].mxu1  ;;  %894 = vst [vmem:[%s1831_s2 + $0x18] sm:$0xff] (!%p1151_p11), %v878_v33 }
 0x156   : > { %861 = vst [vmem:[#allocation2 + $0x30] sm:$0xff] %v845_v35  ;;  %v796_v39 = vadd.f32 %v1314_v2, %v1214_v36  ;;  %v1215_v40 = vpop.f32.mrb[16].mxu0 }
 0x157   : > { %v1216_v41 = vpop.f32.mrb[17].mxu0 }
 0x158   : > { %v846_v42 = vadd.f32 %v796_v39, %v444_v38  ;;  %v1217_v43 = vadd.f32 %v1216_v41, %v1215_v40  ;;  %v934_v41 = vmul.f32 (!%p1151_p11), %v878_v33, %v878_v33 }
 0x159   : > { %v880_v35 = vld [vmem:[#allocation2 + $0x28] sm:$0xff] (!%p1151_p11) }
 0x15a   : > { %862 = vst [vmem:[#allocation2 + $0x38] sm:$0xff] %v846_v42  ;;  %v801_v45 = vadd.f32 %v1217_v43, %v800_v13  ;;  %v1218_v46 = vpop.f32.mrb[18].mxu0  ;;  %896 = vst [vmem:[%s1831_s2 + $0x28] sm:$0xff] (!%p1151_p11), %v880_v35 }
 0x15b   : > { %v1219_v47 = vpop.f32.mrb[19].mxu0 }
 0x15c   : > { %v847_v48 = vadd.f32 %v801_v45, %v445_v44  ;;  %v1220_v49 = vadd.f32 %v1219_v47, %v1218_v46 }
 0x15d   : > { %v881_v36 = vld [vmem:[#allocation2 + $0x30] sm:$0xff] (!%p1151_p11) }
 0x15e   : > { %863 = vst [vmem:[#allocation2 + $0x40] sm:$0xff] %v847_v48  ;;  %v806_v51 = vadd.f32 %v1317_v10, %v1220_v49  ;;  %v1221_v52 = vpop.f32.mrb[20].mxu0  ;;  %v450_v10 = vld [vmem:[#allocation2 + $0x68] sm:$0xff]  ;;  %897 = vst [vmem:[%s1831_s2 + $0x30] sm:$0xff] (!%p1151_p11), %v881_v36 }
 0x15f   : > { %v1222_v53 = vpop.f32.mrb[21].mxu0 }
 0x160   : > { %v848_v54 = vadd.f32 %v806_v51, %v446_v50  ;;  %v1223_v55 = vadd.f32 %v1222_v53, %v1221_v52 }
 0x162   : > { %864 = vst [vmem:[#allocation2 + $0x48] sm:$0xff] %v848_v54  ;;  %v811_v57 = vadd.f32 %v1223_v55, %v810_v21  ;;  %v1224_v58 = vpop.f32.mrb[22].mxu0  ;;  %v936_v54 = vmul.f32 (!%p1151_p11), %v880_v35, %v880_v35 }
 0x163   : > { %v1225_v59 = vpop.f32.mrb[23].mxu0 }
 0x164   : > { %v849_v60 = vadd.f32 %v811_v57, %v447_v56  ;;  %v1226_v61 = vadd.f32 %v1225_v59, %v1224_v58  ;;  %v937_v57 = vmul.f32 (!%p1151_p11), %v881_v36, %v881_v36 }
 0x165   : > { %v883_v38 = vld [vmem:[#allocation2 + $0x40] sm:$0xff] (!%p1151_p11) }
 0x166   : > { %865 = vst [vmem:[#allocation2 + $0x50] sm:$0xff] %v849_v60  ;;  %v816_v63 = vadd.f32 %v1320_v18, %v1226_v61  ;;  %v1227_v0 = vpop.f32.mrb[24].mxu0  ;;  %899 = vst [vmem:[%s1831_s2 + $0x40] sm:$0xff] (!%p1151_p11), %v883_v38 }
 0x167   : > { %v1228_v1 = vpop.f32.mrb[25].mxu0 }
 0x168   : > { %v850_v2 = vadd.f32 %v816_v63, %v448_v62  ;;  %v1229_v3 = vadd.f32 %v1228_v1, %v1227_v0  ;;  %v939_v63 = vmul.f32 (!%p1151_p11), %v883_v38, %v883_v38 }
 0x169   : > { %v884_v42 = vld [vmem:[#allocation2 + $0x48] sm:$0xff] (!%p1151_p11) }
 0x16a   : > { %866 = vst [vmem:[#allocation2 + $0x58] sm:$0xff] %v850_v2  ;;  %v821_v5 = vadd.f32 %v1229_v3, %v820_v29  ;;  %v1230_v6 = vpop.f32.mrb[26].mxu0  ;;  %v931_v29 = vmul.f32 (!%p1151_p11), %v875_v25, %v875_v25  ;;  %900 = vst [vmem:[%s1831_s2 + $0x48] sm:$0xff] (!%p1151_p11), %v884_v42  ;;  %v940_v2 = vmul.f32 (!%p1151_p11), %v884_v42, %v884_v42 }
 0x16b   : > { %v1231_v7 = vpop.f32.mrb[27].mxu0 }
 0x16c   : > { %v851_v8 = vadd.f32 %v821_v5, %v449_v4  ;;  %v1232_v9 = vadd.f32 %v1231_v7, %v1230_v6 }
 0x16d   : > { %v885_v43 = vld [vmem:[#allocation2 + $0x50] sm:$0xff] (!%p1151_p11) }
 0x16e   : > { %867 = vst [vmem:[#allocation2 + $0x60] sm:$0xff] %v851_v8  ;;  %v826_v11 = vadd.f32 %v1323_v26, %v1232_v9  ;;  %v1233_v12 = vpop.f32.mrb[28].mxu0  ;;  %v876_v26 = vld [vmem:[#allocation2 + $0x8] sm:$0xff] (!%p1151_p11)  ;;  %901 = vst [vmem:[%s1831_s2 + $0x50] sm:$0xff] (!%p1151_p11), %v885_v43  ;;  %v941_v5 = vmul.f32 (!%p1151_p11), %v885_v43, %v885_v43 }
 0x16f   : > { %v1234_v13 = vpop.f32.mrb[29].mxu0  ;;  %892 = vst [vmem:[%s1831_s2 + $0x8] sm:$0xff] (!%p1151_p11), %v876_v26  ;;  %v909_v30 = vadd.f32 (!%p1151_p11), %v876_v26, %v875_v25  ;;  %v932_v31 = vmul.f32 (!%p1151_p11), %v876_v26, %v876_v26 }
 0x170   : > { %v852_v14 = vadd.f32 %v826_v11, %v450_v10  ;;  %v1235_v15 = vadd.f32 %v1234_v13, %v1233_v12 }
 0x171   : > { %v947_v39 = vadd.f32 (!%p1151_p11), %v932_v31, %v931_v29  ;;  %v910_v40 = vadd.f32 (!%p1151_p11), %v909_v30, %v877_v27  ;;  %v886_v44 = vld [vmem:[#allocation2 + $0x58] sm:$0xff] (!%p1151_p11) }
 0x172   : > { %868 = vst [vmem:[#allocation2 + $0x68] sm:$0xff] %v852_v14  ;;  %v831_v17 = vadd.f32 %v1235_v15, %v830_v37  ;;  %v1236_v18 = vpop.f32.mrb[30].mxu0  ;;  %v882_v37 = vld [vmem:[#allocation2 + $0x38] sm:$0xff] (!%p1151_p11)  ;;  %902 = vst [vmem:[%s1831_s2 + $0x58] sm:$0xff] (!%p1151_p11), %v886_v44  ;;  %v942_v8 = vmul.f32 (!%p1151_p11), %v886_v44, %v886_v44 }
 0x173   : > { %v1237_v19 = vpop.f32.mrb[31].mxu0  ;;  %898 = vst [vmem:[%s1831_s2 + $0x38] sm:$0xff] (!%p1151_p11), %v882_v37  ;;  %v948_v48 = vadd.f32 (!%p1151_p11), %v947_v39, %v933_v32  ;;  %v911_v49 = vadd.f32 (!%p1151_p11), %v910_v40, %v878_v33  ;;  %v938_v60 = vmul.f32 (!%p1151_p11), %v882_v37, %v882_v37 }
 0x174   : > { %v853_v20 = vadd.f32 %v831_v17, %v451_v16  ;;  %v1238_v21 = vadd.f32 %v1237_v19, %v1236_v18  ;;  %874 = sbr.rel (%p1151_p11) target bundleno = 414 (0x19e), region = 59 }
 0x175   : > { %v887_v45 = vld [vmem:[#allocation2 + $0x60] sm:$0xff] (!%p1151_p11)  ;;  %v949_v52 = vadd.f32 (!%p1151_p11), %v948_v48, %v934_v41 }
 0x176   : > { %869 = vst [vmem:[#allocation2 + $0x70] sm:$0xff] %v853_v20  ;;  %v836_v23 = vadd.f32 %v1326_v34, %v1238_v21  ;;  %v879_v34 = vld [vmem:[#allocation2 + $0x20] sm:$0xff] (!%p1151_p11)  ;;  %903 = vst [vmem:[%s1831_s2 + $0x60] sm:$0xff] (!%p1151_p11), %v887_v45  ;;  %v943_v11 = vmul.f32 (!%p1151_p11), %v887_v45, %v887_v45 }
 0x177   : > { %895 = vst [vmem:[%s1831_s2 + $0x20] sm:$0xff] (!%p1151_p11), %v879_v34  ;;  %v935_v50 = vmul.f32 (!%p1151_p11), %v879_v34, %v879_v34  ;;  %v912_v53 = vadd.f32 (!%p1151_p11), %v911_v49, %v879_v34 }
 0x178   : > { %v854_v24 = vadd.f32 %v836_v23, %v452_v22 }
 0x179   : > { %v888_v46 = vld [vmem:[#allocation2 + $0x68] sm:$0xff] (!%p1151_p11)  ;;  %v950_v55 = vadd.f32 (!%p1151_p11), %v949_v52, %v935_v50  ;;  %v913_v56 = vadd.f32 (!%p1151_p11), %v912_v53, %v880_v35 }
 0x17a   : > { %870 = vst [vmem:[#allocation2 + $0x78] sm:$0xff] %v854_v24  ;;  %904 = vst [vmem:[%s1831_s2 + $0x68] sm:$0xff] (!%p1151_p11), %v888_v46  ;;  %v944_v14 = vmul.f32 (!%p1151_p11), %v888_v46, %v888_v46 }
 0x17b   : > { %v951_v58 = vadd.f32 %v950_v55, %v936_v54  ;;  %v914_v59 = vadd.f32 %v913_v56, %v881_v36 }
 0x17d   : > { %v889_v47 = vld [vmem:[#allocation2 + $0x70] sm:$0xff]  ;;  %v952_v61 = vadd.f32 %v951_v58, %v937_v57  ;;  %v915_v62 = vadd.f32 %v914_v59, %v882_v37 }
 0x17e   : > { %905 = vst [vmem:[%s1831_s2 + $0x70] sm:$0xff] %v889_v47  ;;  %v945_v17 = vmul.f32 %v889_v47, %v889_v47 }
 0x17f   : > { %v953_v0 = vadd.f32 %v952_v61, %v938_v60  ;;  %v916_v1 = vadd.f32 %v915_v62, %v883_v38 }
 0x181   : > { %v890_v51 = vld [vmem:[#allocation2 + $0x78] sm:$0xff]  ;;  %v954_v3 = vadd.f32 %v953_v0, %v939_v63  ;;  %v917_v4 = vadd.f32 %v916_v1, %v884_v42 }
 0x182   : > { %906 = vst [vmem:[%s1831_s2 + $0x78] sm:$0xff] %v890_v51  ;;  %v946_v20 = vmul.f32 %v890_v51, %v890_v51 }
 0x183   : > { %v955_v6 = vadd.f32 %v954_v3, %v940_v2  ;;  %v918_v7 = vadd.f32 %v917_v4, %v885_v43 }
 0x185   : > { %v956_v9 = vadd.f32 %v955_v6, %v941_v5  ;;  %v919_v10 = vadd.f32 %v918_v7, %v886_v44 }
 0x187   : > { %v957_v12 = vadd.f32 %v956_v9, %v942_v8  ;;  %v920_v13 = vadd.f32 %v919_v10, %v887_v45 }
 0x189   : > { %v958_v15 = vadd.f32 %v957_v12, %v943_v11  ;;  %v921_v16 = vadd.f32 %v920_v13, %v888_v46 }
 0x18b   : > { %v959_v18 = vadd.f32 %v958_v15, %v944_v14  ;;  %v922_v19 = vadd.f32 %v921_v16, %v889_v47 }
 0x18d   : > { %v960_v21 = vadd.f32 %v959_v18, %v945_v17  ;;  %v923_v22 = vadd.f32 %v922_v19, %v890_v51 }
 0x18f   : > { %v924_v23 = vrot.slane %v923_v22, 4  ;;  %v961_v24 = vadd.f32 %v960_v21, %v946_v20 }
 0x191   : > { %v925_v25 = vadd.f32 %v924_v23, %v923_v22  ;;  %v962_v26 = vrot.slane %v961_v24, 4 }
 0x193   : > { %v926_v27 = vrot.slane %v925_v25, 2  ;;  %v963_v28 = vadd.f32 %v962_v26, %v961_v24 }
 0x195   : > { %v927_v29 = vadd.f32 %v926_v27, %v925_v25  ;;  %v964_v30 = vrot.slane %v963_v28, 2 }
 0x197   : > { %v928_v31 = vrot.slane %v927_v29, 1  ;;  %v965_v32 = vadd.f32 %v964_v30, %v963_v28 }
 0x199   : > { %v929_v33 = vadd.f32 %v928_v31, %v927_v29  ;;  %v966_v34 = vrot.slane %v965_v32, 1 }
 0x19b   : > { %930 = vst [vmem:[%s1832_s3] sm:$0x1] %v929_v33  ;;  %v967_v35 = vadd.f32 %v966_v34, %v965_v32 }
 0x19d   : > { %968 = vst [vmem:[%s1833_s4] sm:$0x1] %v967_v35 }
 0x19e PF: > { %s15_s19 = sadd.s32 1, %s1473_s19   ;;  %s1834_s15 = smov %s1461_s16 }
 0x19f   : > { %p12_p12 = scmp.ge.s32.totalorder %s15_s19, 5   ;;  %s1835_s16 = smov %s1537_s23 }
 0x1a0   : > { %s1836_s17 = smov %s1469_s18  ;;  %s1837_s18 = smov %s1839_s20 }
 0x1a1   :  { %14 = sbr.rel (!%p12_p12) target bundleno = 3 (0x3), region = 121 }

// kernel: residual_forward.7
= control target key start
LH: loop header
LB: loop body
LE: loop exit
PB: predicated region body
PF: predicated region fallthrough
CT: control target
= control target key end

     0   :  { %s750_s2 = inlined_call_operand.vmem [shape: f32[128,128], index: 2, kind: input, shape index: {}]   ;;  %s751_s1 = inlined_call_operand.vmem [shape: f32[128,128], index: 1, kind: input, shape index: {}]   ;;  %s752_s0 = inlined_call_operand.vmem [shape: f32[128,128], index: 0, kind: input, shape index: {}]   ;;  %s753_s4 = inlined_call_operand.vmem [shape: f32[1,128], index: 4, kind: input, shape index: {}]   ;;  %s754_s5 = inlined_call_operand.vmem [shape: f32[1,128], index: 5, kind: input, shape index: {}]   ;;  %s755_s3 = inlined_call_operand.vmem [shape: f32[1,128], index: 3, kind: input, shape index: {}]   ;;  %s756_s6 = inlined_call_operand.vmem [shape: f32[128,128], index: 6, kind: output, shape index: {}]  }
   0x1   :  { %v39_v0 = vld [vmem:[%s750_s2] sm:$0xff]  ;;  %v40_v1 = vld [vmem:[%s750_s2 + $0x8] sm:$0xff]  ;;  %v41_v2 = vld [vmem:[%s750_s2 + $0x10] sm:$0xff] }
   0x2   :  { %v412_v3 = vpack.c.bf16 %v40_v1, %v39_v0  ;;  %v42_v4 = vld [vmem:[%s750_s2 + $0x18] sm:$0xff]  ;;  %v43_v6 = vld [vmem:[%s750_s2 + $0x20] sm:$0xff]  ;;  %v44_v7 = vld [vmem:[%s750_s2 + $0x28] sm:$0xff] }
   0x3   :  { %v416_v5 = vpack.c.bf16 %v42_v4, %v41_v2  ;;  %v420_v8 = vpack.c.bf16 %v44_v7, %v43_v6  ;;  %v23_v9 = vld [vmem:[%s751_s1] sm:$0xff]  ;;  %v45_v11 = vld [vmem:[%s750_s2 + $0x30] sm:$0xff]  ;;  %v46_v12 = vld [vmem:[%s750_s2 + $0x38] sm:$0xff] }
   0x4   :  { %413 = vmatprep.subr.bf16.mxu0 %v412_v3  ;;  %444 = vmatprep.subr.bf16.mxu1 %v412_v3  ;;  %v31_v10 = vld [vmem:[%s751_s1 + $0x40] sm:$0xff]  ;;  %v424_v13 = vpack.c.bf16 %v46_v12, %v45_v11  ;;  %v48_v15 = vld [vmem:[%s750_s2 + $0x48] sm:$0xff]  ;;  %v49_v17 = vld [vmem:[%s750_s2 + $0x50] sm:$0xff] }
   0x5   :  { %415 = vmatpush3.bf16.msra.mxu0 %v412_v3  ;;  %452 = vmatpush3.bf16.msra.mxu1 %v412_v3  ;;  %v47_v14 = vld [vmem:[%s750_s2 + $0x40] sm:$0xff]  ;;  %v50_v18 = vld [vmem:[%s750_s2 + $0x58] sm:$0xff]  ;;  %v52_v21 = vld [vmem:[%s750_s2 + $0x68] sm:$0xff] }
   0x6   :  { %417 = vmatprep.subr.bf16.mxu0 %v416_v5  ;;  %445 = vmatprep.subr.bf16.mxu1 %v416_v5  ;;  %v428_v16 = vpack.c.bf16 %v48_v15, %v47_v14  ;;  %v432_v19 = vpack.c.bf16 %v50_v18, %v49_v17  ;;  %v51_v20 = vld [vmem:[%s750_s2 + $0x60] sm:$0xff]  ;;  %v53_v23 = vld [vmem:[%s750_s2 + $0x70] sm:$0xff]  ;;  %v54_v24 = vld [vmem:[%s750_s2 + $0x78] sm:$0xff] }
   0x7   :  { %388 = vmatprep.mubr.f32.mxu0 %v23_v9  ;;  %400 = vmatprep.mubr.f32.mxu1 %v31_v10  ;;  %v436_v22 = vpack.c.bf16 %v52_v21, %v51_v20  ;;  %v440_v25 = vpack.c.bf16 %v54_v24, %v53_v23  ;;  %v24_v26 = vld [vmem:[%s751_s1 + $0x8] sm:$0xff]  ;;  %v25_v28 = vld [vmem:[%s751_s1 + $0x10] sm:$0xff]  ;;  %v26_v30 = vld [vmem:[%s751_s1 + $0x18] sm:$0xff] }
   0x8   :  { %v32_v27 = vld [vmem:[%s751_s1 + $0x48] sm:$0xff]  ;;  %v33_v29 = vld [vmem:[%s751_s1 + $0x50] sm:$0xff]  ;;  %v34_v31 = vld [vmem:[%s751_s1 + $0x58] sm:$0xff] }
   0x9   :  { %419 = vmatpush3.bf16.msra.mxu0 %v416_v5  ;;  %453 = vmatpush3.bf16.msra.mxu1 %v416_v5  ;;  %v27_v32 = vld [vmem:[%s751_s1 + $0x20] sm:$0xff]  ;;  %v28_v34 = vld [vmem:[%s751_s1 + $0x28] sm:$0xff]  ;;  %v29_v36 = vld [vmem:[%s751_s1 + $0x30] sm:$0xff] }
   0xa   :  { %421 = vmatprep.subr.bf16.mxu0 %v420_v8  ;;  %446 = vmatprep.subr.bf16.mxu1 %v420_v8  ;;  %v35_v33 = vld [vmem:[%s751_s1 + $0x60] sm:$0xff]  ;;  %v36_v35 = vld [vmem:[%s751_s1 + $0x68] sm:$0xff]  ;;  %v37_v37 = vld [vmem:[%s751_s1 + $0x70] sm:$0xff] }
   0xb   :  { %v30_v38 = vld [vmem:[%s751_s1 + $0x38] sm:$0xff]  ;;  %v208_v40 = vld [vmem:[%s752_s0 + $0x8] sm:$0xff]  ;;  %v597_v41 = vld [vmem:[%s753_s4] ss:$0 sm:$0xff] }
   0xc   :  { %v38_v39 = vld [vmem:[%s751_s1 + $0x78] sm:$0xff]  ;;  %v216_v42 = vld [vmem:[%s752_s0 + $0x48] sm:$0xff]  ;;  %v207_v43 = vld [vmem:[%s752_s0] sm:$0xff]  ;;  %v231_v47 = vmul.f32 %v597_v41, %v208_v40 }
   0xd   :  { %423 = vmatpush3.bf16.msra.mxu0 %v420_v8  ;;  %454 = vmatpush3.bf16.msra.mxu1 %v420_v8  ;;  %v215_v44 = vld [vmem:[%s752_s0 + $0x40] sm:$0xff]  ;;  %v210_v45 = vld [vmem:[%s752_s0 + $0x18] sm:$0xff]  ;;  %v239_v48 = vmul.f32 %v597_v41, %v216_v42  ;;  %v209_v49 = vld [vmem:[%s752_s0 + $0x10] sm:$0xff]  ;;  %v230_v52 = vmul.f32 %v597_v41, %v207_v43 }
   0xe   :  { %425 = vmatprep.subr.bf16.mxu0 %v424_v13  ;;  %447 = vmatprep.subr.bf16.mxu1 %v424_v13  ;;  %v218_v46 = vld [vmem:[%s752_s0 + $0x58] sm:$0xff]  ;;  %v217_v50 = vld [vmem:[%s752_s0 + $0x50] sm:$0xff]  ;;  %v625_v51 = vld [vmem:[%s754_s5] ss:$0 sm:$0xff]  ;;  %v238_v53 = vmul.f32 %v597_v41, %v215_v44  ;;  %v233_v56 = vmul.f32 %v597_v41, %v210_v45  ;;  %v232_v61 = vmul.f32 %v597_v41, %v209_v49 }
   0xf   :  { %v212_v54 = vld [vmem:[%s752_s0 + $0x28] sm:$0xff]  ;;  %v241_v57 = vmul.f32 %v597_v41, %v218_v46  ;;  %v211_v58 = vld [vmem:[%s752_s0 + $0x20] sm:$0xff]  ;;  %v240_v62 = vmul.f32 %v597_v41, %v217_v50  ;;  %v254_v63 = vadd.f32 %v625_v51, %v231_v47  ;;  %v262_v0 = vadd.f32 %v625_v51, %v239_v48 }
  0x10   :  { %v220_v55 = vld [vmem:[%s752_s0 + $0x68] sm:$0xff]  ;;  %v219_v59 = vld [vmem:[%s752_s0 + $0x60] sm:$0xff]  ;;  %v235_v1 = vmul.f32 %v597_v41, %v212_v54  ;;  %v253_v5 = vadd.f32 %v625_v51, %v230_v52  ;;  %v261_v6 = vadd.f32 %v625_v51, %v238_v53  ;;  %v234_v7 = vmul.f32 %v597_v41, %v211_v58 }
  0x11   :  { %427 = vmatpush3.bf16.msra.mxu0 %v424_v13  ;;  %455 = vmatpush3.bf16.msra.mxu1 %v424_v13  ;;  %v646_v60 = vld [vmem:[%s755_s3] ss:$0 sm:$0xff]  ;;  %v243_v2 = vmul.f32 %v597_v41, %v220_v55  ;;  %v242_v8 = vmul.f32 %v597_v41, %v219_v59  ;;  %v256_v13 = vadd.f32 %v625_v51, %v233_v56 }
  0x12   :  { %429 = vmatprep.subr.bf16.mxu0 %v428_v16  ;;  %448 = vmatprep.subr.bf16.mxu1 %v428_v16  ;;  %v264_v14 = vadd.f32 %v625_v51, %v241_v57  ;;  %v255_v17 = vadd.f32 %v625_v51, %v232_v61  ;;  %v263_v18 = vadd.f32 %v625_v51, %v240_v62 }
  0x13   :  { %v258_v21 = vadd.f32 %v625_v51, %v235_v1 }
  0x15   :  { %431 = vmatpush3.bf16.msra.mxu0 %v428_v16  ;;  %456 = vmatpush3.bf16.msra.mxu1 %v428_v16 }
  0x16   :  { %433 = vmatprep.subr.bf16.mxu0 %v432_v19  ;;  %449 = vmatprep.subr.bf16.mxu1 %v432_v19 }
  0x19   :  { %435 = vmatpush3.bf16.msra.mxu0 %v432_v19  ;;  %457 = vmatpush3.bf16.msra.mxu1 %v432_v19 }
  0x1a   :  { %437 = vmatprep.subr.bf16.mxu0 %v436_v22  ;;  %450 = vmatprep.subr.bf16.mxu1 %v436_v22 }
  0x1d   :  { %439 = vmatpush3.bf16.msra.mxu0 %v436_v22  ;;  %458 = vmatpush3.bf16.msra.mxu1 %v436_v22  ;;  %v266_v22 = vadd.f32 %v625_v51, %v243_v2 }
  0x1e   :  { %441 = vmatprep.subr.bf16.mxu0 %v440_v25  ;;  %451 = vmatprep.subr.bf16.mxu1 %v440_v25 }
  0x21   :  { %443 = vmatpush3.bf16.msra.mxu0 %v440_v25  ;;  %459 = vmatpush3.bf16.msra.mxu1 %v440_v25 }
  0x24   :  { %389 = vmatmul.mubr.f32.vlgmr.msra.gmra.mrb[0].mxu0 %v24_v26  ;;  %401 = vmatmul.mubr.f32.vlgmr.msra.gmra.mrb[0].mxu1 %v32_v27  ;;  %v257_v27 = vadd.f32 %v625_v51, %v234_v7 }
  0x25   :  { %391 = vmatprep.mubr.f32.mxu0 %v25_v28  ;;  %403 = vmatprep.mubr.f32.mxu1 %v33_v29  ;;  %v265_v28 = vadd.f32 %v625_v51, %v242_v8  ;;  %v214_v29 = vld [vmem:[%s752_s0 + $0x38] sm:$0xff] }
  0x26   :  { %v237_v46 = vmul.f32 %v597_v41, %v214_v29 }
  0x28   :  { %392 = vmatmul.mubr.f32.gmra.mrb[2].mxu0 %v26_v30  ;;  %404 = vmatmul.mubr.f32.gmra.mrb[2].mxu1 %v34_v31  ;;  %v222_v30 = vld [vmem:[%s752_s0 + $0x78] sm:$0xff] }
  0x29   :  { %394 = vmatprep.mubr.f32.mxu0 %v27_v32  ;;  %406 = vmatprep.mubr.f32.mxu1 %v35_v33  ;;  %v245_v47 = vmul.f32 %v597_v41, %v222_v30 }
  0x2c   :  { %395 = vmatmul.mubr.f32.gmra.mrb[4].mxu0 %v28_v34  ;;  %407 = vmatmul.mubr.f32.gmra.mrb[4].mxu1 %v36_v35 }
  0x2d   :  { %397 = vmatprep.mubr.f32.mxu0 %v29_v36  ;;  %409 = vmatprep.mubr.f32.mxu1 %v37_v37  ;;  %v213_v37 = vld [vmem:[%s752_s0 + $0x30] sm:$0xff] }
  0x2e   :  { %v236_v53 = vmul.f32 %v597_v41, %v213_v37 }
  0x30   :  { %398 = vmatmul.mubr.f32.gmra.mrb[6].mxu0 %v30_v38  ;;  %410 = vmatmul.mubr.f32.gmra.mrb[6].mxu1 %v38_v39  ;;  %v221_v38 = vld [vmem:[%s752_s0 + $0x70] sm:$0xff] }
  0x31   :  { %v244_v54 = vmul.f32 %v597_v41, %v221_v38 }
  0xf7   :  { %v390_v3 = vpop.f32.mrb[0].mxu0  ;;  %v402_v4 = vpop.f32.mrb[0].mxu1 }
  0xf8   :  { %v134_v9 = vadd.f32 %v390_v3, %v646_v60  ;;  %v174_v10 = vadd.f32 %v402_v4, %v646_v60  ;;  %v128_v11 = vpop.f32.mrb[1].mxu0  ;;  %v168_v12 = vpop.f32.mrb[1].mxu1  ;;  %v260_v3 = vadd.f32 %v625_v51, %v237_v46  ;;  %v268_v4 = vadd.f32 %v625_v51, %v245_v47 }
  0xf9   :  { %v129_v15 = vadd.f32 %v646_v60, %v128_v11  ;;  %v169_v16 = vadd.f32 %v646_v60, %v168_v12 }
  0xfa   :  { %v270_v19 = vadd.f32 %v254_v63, %v134_v9  ;;  %v278_v20 = vadd.f32 %v262_v0, %v174_v10  ;;  %v259_v9 = vadd.f32 %v625_v51, %v236_v53  ;;  %v267_v10 = vadd.f32 %v625_v51, %v244_v54 }
  0xfb   :  { %v269_v23 = vadd.f32 %v253_v5, %v129_v15  ;;  %v277_v24 = vadd.f32 %v261_v6, %v169_v16  ;;  %v393_v25 = vpop.f32.mrb[2].mxu0  ;;  %v405_v26 = vpop.f32.mrb[2].mxu1 }
  0xfc   :  { %v286_v31 = vmax.f32 %v270_v19, 0.0  ;;  %v294_v32 = vmax.f32 %v278_v20, 0.0  ;;  %v144_v33 = vadd.f32 %v393_v25, %v646_v60  ;;  %v184_v34 = vadd.f32 %v405_v26, %v646_v60  ;;  %v138_v35 = vpop.f32.mrb[3].mxu0  ;;  %v178_v36 = vpop.f32.mrb[3].mxu1 }
  0xfd   :  { %v285_v39 = vmax.f32 %v269_v23, 0.0  ;;  %v293_v40 = vmax.f32 %v277_v24, 0.0  ;;  %v139_v42 = vadd.f32 %v646_v60, %v138_v35  ;;  %v179_v43 = vadd.f32 %v646_v60, %v178_v36 }
  0xfe   :  { %302 = vst [vmem:[%s756_s6 + $0x8] sm:$0xff] %v286_v31  ;;  %310 = vst [vmem:[%s756_s6 + $0x48] sm:$0xff] %v294_v32  ;;  %v272_v44 = vadd.f32 %v256_v13, %v144_v33  ;;  %v280_v45 = vadd.f32 %v264_v14, %v184_v34 }
  0xff   :  { %301 = vst [vmem:[%s756_s6] sm:$0xff] %v285_v39  ;;  %309 = vst [vmem:[%s756_s6 + $0x40] sm:$0xff] %v293_v40  ;;  %v271_v48 = vadd.f32 %v255_v17, %v139_v42  ;;  %v279_v49 = vadd.f32 %v263_v18, %v179_v43  ;;  %v396_v50 = vpop.f32.mrb[4].mxu0  ;;  %v408_v52 = vpop.f32.mrb[4].mxu1 }
 0x100   :  { %v288_v55 = vmax.f32 %v272_v44, 0.0  ;;  %v296_v56 = vmax.f32 %v280_v45, 0.0  ;;  %v154_v57 = vadd.f32 %v396_v50, %v646_v60  ;;  %v194_v58 = vadd.f32 %v408_v52, %v646_v60  ;;  %v148_v59 = vpop.f32.mrb[5].mxu0  ;;  %v188_v61 = vpop.f32.mrb[5].mxu1 }
 0x101   :  { %v287_v62 = vmax.f32 %v271_v48, 0.0  ;;  %v295_v63 = vmax.f32 %v279_v49, 0.0  ;;  %v149_v0 = vadd.f32 %v646_v60, %v148_v59  ;;  %v189_v1 = vadd.f32 %v646_v60, %v188_v61 }
 0x102   :  { %304 = vst [vmem:[%s756_s6 + $0x18] sm:$0xff] %v288_v55  ;;  %312 = vst [vmem:[%s756_s6 + $0x58] sm:$0xff] %v296_v56  ;;  %v274_v41 = vadd.f32 %v258_v21, %v154_v57  ;;  %v282_v2 = vadd.f32 %v266_v22, %v194_v58 }
 0x103   :  { %303 = vst [vmem:[%s756_s6 + $0x10] sm:$0xff] %v287_v62  ;;  %311 = vst [vmem:[%s756_s6 + $0x50] sm:$0xff] %v295_v63  ;;  %v273_v5 = vadd.f32 %v257_v27, %v149_v0  ;;  %v281_v6 = vadd.f32 %v265_v28, %v189_v1  ;;  %v399_v7 = vpop.f32.mrb[6].mxu0  ;;  %v411_v8 = vpop.f32.mrb[6].mxu1 }
 0x104   :  { %v290_v11 = vmax.f32 %v274_v41, 0.0  ;;  %v298_v12 = vmax.f32 %v282_v2, 0.0  ;;  %v164_v13 = vadd.f32 %v399_v7, %v646_v60  ;;  %v204_v14 = vadd.f32 %v411_v8, %v646_v60  ;;  %v158_v15 = vpop.f32.mrb[7].mxu0  ;;  %v198_v16 = vpop.f32.mrb[7].mxu1 }
 0x105   :  { %v289_v17 = vmax.f32 %v273_v5, 0.0  ;;  %v297_v18 = vmax.f32 %v281_v6, 0.0  ;;  %v159_v19 = vadd.f32 %v646_v60, %v158_v15  ;;  %v199_v20 = vadd.f32 %v646_v60, %v198_v16 }
 0x106   :  { %306 = vst [vmem:[%s756_s6 + $0x28] sm:$0xff] %v290_v11  ;;  %314 = vst [vmem:[%s756_s6 + $0x68] sm:$0xff] %v298_v12  ;;  %v276_v51 = vadd.f32 %v260_v3, %v164_v13  ;;  %v284_v21 = vadd.f32 %v268_v4, %v204_v14 }
 0x107   :  { %305 = vst [vmem:[%s756_s6 + $0x20] sm:$0xff] %v289_v17  ;;  %313 = vst [vmem:[%s756_s6 + $0x60] sm:$0xff] %v297_v18  ;;  %v275_v22 = vadd.f32 %v259_v9, %v159_v19  ;;  %v283_v60 = vadd.f32 %v267_v10, %v199_v20 }
 0x108   :  { %v292_v23 = vmax.f32 %v276_v51, 0.0  ;;  %v300_v24 = vmax.f32 %v284_v21, 0.0 }
 0x109   :  { %v291_v25 = vmax.f32 %v275_v22, 0.0  ;;  %v299_v26 = vmax.f32 %v283_v60, 0.0 }
 0x10a   :  { %308 = vst [vmem:[%s756_s6 + $0x38] sm:$0xff] %v292_v23  ;;  %316 = vst [vmem:[%s756_s6 + $0x78] sm:$0xff] %v300_v24 }
 0x10b   :  { %307 = vst [vmem:[%s756_s6 + $0x30] sm:$0xff] %v291_v25  ;;  %315 = vst [vmem:[%s756_s6 + $0x70] sm:$0xff] %v299_v26 }

</bundles_post_ra>
